<compile_context>
chip_gen: v6e
topology: v6e:2x2x1
jax: 0.10.0
libtpu: 0.0.40
codegen_flags: <defaults>
</compile_context>

<pallas_src>
import functools

import jax
import jax.numpy as jnp
from jax import lax
from jax.experimental import pallas as pl
from jax.experimental.pallas import tpu as pltpu

BN_EPS = 1e-5


# --------------------------------------------------------------------------
# In-kernel helpers
# --------------------------------------------------------------------------
def _emit_stats(s_ref, ss_ref, y_f32):
    """Per-channel partial sum / sum-of-squares for this tile (blocks (1,1,C))."""
    s_ref[...] = jnp.sum(y_f32, axis=0, keepdims=True).reshape(s_ref.shape)
    ss_ref[...] = jnp.sum(y_f32 * y_f32, axis=0, keepdims=True).reshape(ss_ref.shape)


def _finalize_bn(s_ref, ss_ref, g_ref, b_ref, inv_count):
    """Partial (sum, sumsq) -> per-channel scale/shift (biased var, eps=1e-5).

    Recomputed per grid step from a tiny resident (n_tiles, 1, C) block; this
    keeps the BN finalize inside the pipelined kernels instead of three small
    XLA reductions on the serial path between passes.
    """
    s = jnp.sum(s_ref[...], axis=0)        # (1, C)
    ss = jnp.sum(ss_ref[...], axis=0)      # (1, C)
    mean = s * inv_count
    # TODO(synk): E[y^2]-E[y]^2 in f32 can cancel if |mean| >> std per channel;
    # switch to a Chan-style (mean, M2) combine if that regime appears.
    var = jnp.maximum(ss * inv_count - mean * mean, 0.0)
    scale = g_ref[...] * lax.rsqrt(var + BN_EPS)
    shift = b_ref[...] - mean * scale
    return scale, shift


# --------------------------------------------------------------------------
# Kernels
# --------------------------------------------------------------------------
def _conv1_stats_kernel(x_ref, w_ref, y_ref, s_ref, ss_ref):
    """conv1 (kernel_size=1): y = x @ w1, plus BN1 partial stats."""
    c_in = x_ref.shape[-1]
    x2 = x_ref[...].reshape(-1, c_in).astype(w_ref.dtype)
    y = jnp.dot(x2, w_ref[...], preferred_element_type=jnp.float32)
    y_ref[...] = y.reshape(y_ref.shape).astype(y_ref.dtype)
    _emit_stats(s_ref, ss_ref, y)


def _bn_conv3_stats_kernel(s_in, ss_in, g_ref, b_ref, hc_ref, hp_ref, hn_ref,
                           w_ref, y_ref, s_out, ss_out, *, inv_count, halo):
    """BN1+ReLU, then conv2 (k=3, padding=1) as three matmuls into one f32 acc."""
    j = pl.program_id(0)
    n_j = pl.num_programs(0)
    scale, shift = _finalize_bn(s_in, ss_in, g_ref, b_ref, inv_count)
    wdt = w_ref.dtype

    def bn_relu(v):
        return jnp.maximum(scale * v.astype(jnp.float32) + shift, 0.0)

    h = bn_relu(hc_ref[...]).astype(wdt)                            # (N, TL, Cm)
    prev = (bn_relu(hp_ref[:, halo - 1:halo, :])
            * (j > 0).astype(jnp.float32)).astype(wdt)              # zero-pad l=0
    nxt = (bn_relu(hn_ref[:, 0:1, :])
           * (j < n_j - 1).astype(jnp.float32)).astype(wdt)         # zero-pad l=L-1

    tap_m = jnp.concatenate([prev, h[:, :-1, :]], axis=1)           # value at l-1
    tap_p = jnp.concatenate([h[:, 1:, :], nxt], axis=1)             # value at l+1

    rows = h.shape[0] * h.shape[1]
    c = h.shape[-1]
    acc = jnp.dot(h.reshape(rows, c), w_ref[1],
                  preferred_element_type=jnp.float32)
    acc += jnp.dot(tap_m.reshape(rows, c), w_ref[0],
                   preferred_element_type=jnp.float32)
    acc += jnp.dot(tap_p.reshape(rows, c), w_ref[2],
                   preferred_element_type=jnp.float32)
    y_ref[...] = acc.reshape(y_ref.shape).astype(y_ref.dtype)
    _emit_stats(s_out, ss_out, acc)


def _bn_conv1_stats_kernel(s_in, ss_in, g_ref, b_ref, h_ref, w_ref,
                           y_ref, s_out, ss_out, *, inv_count):
    """BN2+ReLU then conv3 (kernel_size=1), plus BN3 partial stats."""
    scale, shift = _finalize_bn(s_in, ss_in, g_ref, b_ref, inv_count)
    h = jnp.maximum(scale * h_ref[...].astype(jnp.float32) + shift, 0.0)
    c = h.shape[-1]
    y = jnp.dot(h.reshape(-1, c).astype(w_ref.dtype), w_ref[...],
                preferred_element_type=jnp.float32)
    y_ref[...] = y.reshape(y_ref.shape).astype(y_ref.dtype)
    _emit_stats(s_out, ss_out, y)


def _bn_res_relu_kernel(s_in, ss_in, g_ref, b_ref, y_ref, res_ref, o_ref,
                        *, inv_count):
    """BN3, residual add (identity shortcut), final ReLU (last block of layer)."""
    scale, shift = _finalize_bn(s_in, ss_in, g_ref, b_ref, inv_count)
    h = (scale * y_ref[...].astype(jnp.float32) + shift
         + res_ref[...].astype(jnp.float32))
    o_ref[...] = jnp.maximum(h, 0.0).astype(o_ref.dtype)


def _bn_res_relu_conv1_stats_kernel(s_in, ss_in, g_ref, b_ref, y_ref, res_ref,
                                    w_ref, o_ref, y1_ref, s_out, ss_out,
                                    *, inv_count):
    """Cross-block fusion: BN3 + residual + ReLU of block i, then conv1 (+BN1
    partial stats) of block i+1; saves one HBM read of the widest tensor."""
    scale, shift = _finalize_bn(s_in, ss_in, g_ref, b_ref, inv_count)
    h = jnp.maximum(scale * y_ref[...].astype(jnp.float32) + shift
                    + res_ref[...].astype(jnp.float32), 0.0)        # (N, TL, Cout)
    o_ref[...] = h.astype(o_ref.dtype)
    c = h.shape[-1]
    y = jnp.dot(h.reshape(-1, c).astype(w_ref.dtype), w_ref[...],
                preferred_element_type=jnp.float32)
    y1_ref[...] = y.reshape(y1_ref.shape).astype(y1_ref.dtype)
    _emit_stats(s_out, ss_out, y)


# --------------------------------------------------------------------------
# Budget / tile selection
# --------------------------------------------------------------------------
def _vmem_budget_bytes():
    """Generation-aware scoped-VMEM budget (per TensorCore)."""
    phys = 64 * 1024 * 1024          # conservative fallback (v7x = 64 MiB / TC)
    try:
        info = pltpu.get_tpu_info()
        phys = int(getattr(info, "vmem_capacity_bytes", phys) or phys)
    except Exception:
        pass
    # ~48 MiB on v7x (64 MiB), ~96 MiB on v5e/v6e (128 MiB).  Always explicit:
    # v5e's default scoped limit is only 16 MiB.
    return max(32 * 1024 * 1024, min(3 * phys // 4, phys - 16 * 1024 * 1024))


def _pick_tile_l(L, N, c_in, c_mid, c_out, a_b, x_b, m_b, g, budget):
    """Largest L-divisor tile (multiple of g, <= 1024 rows) whose worst-pass
    per-step VMEM footprint fits the budget; prefer >= 2 grid steps so v7x's
    second TensorCore gets work under dimension_semantics=("parallel",)."""
    f = 4  # f32 temp bytes
    per_row = N * max(
        2 * (c_in * x_b + c_mid * a_b) + f * (c_in + c_mid),               # pass 1
        4 * c_mid * a_b + 3 * c_mid * m_b + 2 * f * c_mid,                 # pass 2
        2 * (c_mid + c_out) * a_b + f * (c_mid + c_out),                   # pass 3
        2 * (2 * c_out * x_b + c_out * a_b + c_mid * a_b) + 2 * f * c_out,  # pass 4
    )
    fixed = (2 * m_b * (c_in * c_mid + 3 * c_mid * c_mid + c_mid * c_out)
             + 4 * 1024 * 1024)  # weights (double-buffered) + slack
    cands = [t for t in range(g, min(L, 1024) + 1, g) if L % t == 0]
    fits = [t for t in cands if per_row * t + fixed <= budget]
    if not fits:
        return g
    multi = [t for t in fits if L // t >= 2]
    return max(multi) if multi else max(fits)


# --------------------------------------------------------------------------
# Wrappers
# --------------------------------------------------------------------------
def reslayer_forward_nlc(x, blocks, *, tile_l=None,
                         act_dtype=jnp.bfloat16, matmul_dtype=jnp.bfloat16):
    """Chain of stride-1, identity-shortcut bottleneck blocks; x is (N, L, C)."""
    N, L, c_in = x.shape
    c_mid = blocks[0]["w1"].shape[1]
    c_out = blocks[0]["w3"].shape[1]
    if c_in != c_out:
        raise ValueError("identity shortcut needs in_channels == 4 * out_channels")
    for p in blocks:
        assert p["w1"].shape == (c_in, c_mid)
        assert p["w2"].shape == (3, c_mid, c_mid)
        assert p["w3"].shape == (c_mid, c_out)

    a_bytes = jnp.dtype(act_dtype).itemsize
    x_bytes = x.dtype.itemsize
    m_bytes = jnp.dtype(matmul_dtype).itemsize
    g = 16 if a_bytes < 4 else 8        # halo rows / row granularity (bf16 pack)
    if L % g:
        raise ValueError(f"L must be a multiple of {g}")

    budget = _vmem_budget_bytes()
    if tile_l is None:
        tile_l = _pick_tile_l(L, N, c_in, c_mid, c_out,
                              a_bytes, x_bytes, m_bytes, g, budget)
    assert L % tile_l == 0 and tile_l % g == 0
    n_tiles = L // tile_l
    halo_blk = tile_l // g
    last_blk = L // g - 1
    inv_count = 1.0 / float(N * L)

    cparams = pltpu.CompilerParams(
        dimension_semantics=("parallel",), vmem_limit_bytes=int(budget))

    def row_spec(c):
        return pl.BlockSpec((N, tile_l, c), lambda j: (0, j, 0))

    def const_spec(shape):
        return pl.BlockSpec(shape, lambda j: (0,) * len(shape))

    def stat_in_spec(c):
        return pl.BlockSpec((n_tiles, 1, c), lambda j: (0, 0, 0))

    def stat_out_spec(c):
        return pl.BlockSpec((1, 1, c), lambda j: (j, 0, 0))

    def stat_shape(c):
        return jax.ShapeDtypeStruct((n_tiles, 1, c), jnp.float32)

    def act_shape(c):
        return jax.ShapeDtypeStruct((N, L, c), act_dtype)

    prev_spec = pl.BlockSpec(
        (N, g, c_mid), lambda j: (0, jnp.maximum(j * halo_blk - 1, 0), 0))
    next_spec = pl.BlockSpec(
        (N, g, c_mid), lambda j: (0, jnp.minimum((j + 1) * halo_blk, last_blk), 0))

    def prep(p):
        # Conv biases are dropped (bias before batch-stats BN is an exact no-op).
        return dict(
            w1=p["w1"].astype(matmul_dtype),
            w2=p["w2"].astype(matmul_dtype),
            w3=p["w3"].astype(matmul_dtype),
            g1=p["g1"].reshape(1, -1), b1=p["be1"].reshape(1, -1),
            g2=p["g2"].reshape(1, -1), b2=p["be2"].reshape(1, -1),
            g3=p["g3"].reshape(1, -1), b3=p["be3"].reshape(1, -1))

    def call_conv1(inp, w1):
        return pl.pallas_call(
            _conv1_stats_kernel,
            grid=(n_tiles,),
            in_specs=[row_spec(c_in), const_spec((c_in, c_mid))],
            out_specs=(row_spec(c_mid), stat_out_spec(c_mid), stat_out_spec(c_mid)),
            out_shape=(act_shape(c_mid), stat_shape(c_mid), stat_shape(c_mid)),
            compiler_params=cparams,
            cost_estimate=pl.CostEstimate(
                flops=2 * N * L * c_in * c_mid, transcendentals=0,
                bytes_accessed=N * L * (c_in * x_bytes + c_mid * a_bytes)),
        )(inp, w1)

    def call_conv3(y1, s1, ss1, p):
        return pl.pallas_call(
            functools.partial(_bn_conv3_stats_kernel, inv_count=inv_count, halo=g),
            grid=(n_tiles,),
            in_specs=[stat_in_spec(c_mid), stat_in_spec(c_mid),
                      const_spec((1, c_mid)), const_spec((1, c_mid)),
                      row_spec(c_mid), prev_spec, next_spec,
                      const_spec((3, c_mid, c_mid))],
            out_specs=(row_spec(c_mid), stat_out_spec(c_mid), stat_out_spec(c_mid)),
            out_shape=(act_shape(c_mid), stat_shape(c_mid), stat_shape(c_mid)),
            compiler_params=cparams,
            cost_estimate=pl.CostEstimate(
                flops=2 * N * L * 3 * c_mid * c_mid, transcendentals=0,
                bytes_accessed=(2 * N * L * c_mid * a_bytes
                                + 3 * c_mid * c_mid * m_bytes)),
        )(s1, ss1, p["g1"], p["b1"], y1, y1, y1, p["w2"])

    def call_conv1b(y2, s2, ss2, p):
        return pl.pallas_call(
            functools.partial(_bn_conv1_stats_kernel, inv_count=inv_count),
            grid=(n_tiles,),
            in_specs=[stat_in_spec(c_mid), stat_in_spec(c_mid),
                      const_spec((1, c_mid)), const_spec((1, c_mid)),
                      row_spec(c_mid), const_spec((c_mid, c_out))],
            out_specs=(row_spec(c_out), stat_out_spec(c_out), stat_out_spec(c_out)),
            out_shape=(act_shape(c_out), stat_shape(c_out), stat_shape(c_out)),
            compiler_params=cparams,
            cost_estimate=pl.CostEstimate(
                flops=2 * N * L * c_mid * c_out, transcendentals=0,
                bytes_accessed=N * L * (c_mid + c_out) * a_bytes),
        )(s2, ss2, p["g2"], p["b2"], y2, p["w3"])

    def call_final(y3, s3, ss3, res, p):
        return pl.pallas_call(
            functools.partial(_bn_res_relu_kernel, inv_count=inv_count),
            grid=(n_tiles,),
            in_specs=[stat_in_spec(c_out), stat_in_spec(c_out),
                      const_spec((1, c_out)), const_spec((1, c_out)),
                      row_spec(c_out), row_spec(c_out)],
            out_specs=row_spec(c_out),
            out_shape=jax.ShapeDtypeStruct((N, L, c_out), x.dtype),
            compiler_params=cparams,
            cost_estimate=pl.CostEstimate(
                flops=3 * N * L * c_out, transcendentals=0,
                bytes_accessed=N * L * c_out
                * (a_bytes + res.dtype.itemsize + x_bytes)),
        )(s3, ss3, p["g3"], p["b3"], y3, res)

    def call_fused(y3, s3, ss3, res, p, w1_next):
        return pl.pallas_call(
            functools.partial(_bn_res_relu_conv1_stats_kernel, inv_count=inv_count),
            grid=(n_tiles,),
            in_specs=[stat_in_spec(c_out), stat_in_spec(c_out),
                      const_spec((1, c_out)), const_spec((1, c_out)),
                      row_spec(c_out), row_spec(c_out),
                      const_spec((c_out, c_mid))],
            out_specs=(row_spec(c_out), row_spec(c_mid),
                       stat_out_spec(c_mid), stat_out_spec(c_mid)),
            out_shape=(act_shape(c_out), act_shape(c_mid),
                       stat_shape(c_mid), stat_shape(c_mid)),
            compiler_params=cparams,
            cost_estimate=pl.CostEstimate(
                flops=2 * N * L * c_out * c_mid + 3 * N * L * c_out,
                transcendentals=0,
                bytes_accessed=N * L * (c_out * (2 * a_bytes + res.dtype.itemsize)
                                        + c_mid * a_bytes)),
        )(s3, ss3, p["g3"], p["b3"], y3, res, w1_next)

    pb = [prep(p) for p in blocks]
    res = x
    y1, s1, ss1 = call_conv1(x, pb[0]["w1"])
    out = None
    for i, p in enumerate(pb):
        y2, s2, ss2 = call_conv3(y1, s1, ss1, p)
        y3, s3, ss3 = call_conv1b(y2, s2, ss2, p)
        if i + 1 < len(pb):
            # Fused: emits block-i output (next residual) AND next block's y1.
            res, y1, s1, ss1 = call_fused(y3, s3, ss3, res, p, pb[i + 1]["w1"])
        else:
            out = call_final(y3, s3, ss3, res, p)
    return out


def resblock_forward_nlc(x, params, **kw):
    return reslayer_forward_nlc(x, [params], **kw)


def reslayer_forward_ncl(x_ncl, blocks, **kw):
    """PyTorch-layout adapter: (N, C, L) in/out.  For a full ResUNet keep
    activations NLC between stages; the transposes here are for parity only."""
    x = jnp.transpose(x_ncl, (0, 2, 1))
    out = reslayer_forward_nlc(x, blocks, **kw)
    return jnp.transpose(out, (0, 2, 1))


def resblock_forward_ncl(x_ncl, params, **kw):
    return reslayer_forward_ncl(x_ncl, [params], **kw)


# --------------------------------------------------------------------------
# Pure-JAX reference (faithful PyTorch train-mode math, incl. conv biases)
# --------------------------------------------------------------------------
def _resblock_reference_nlc(x, p):
    def bn(y, g, b):
        m = y.mean((0, 1), keepdims=True)
        v = ((y - m) ** 2).mean((0, 1), keepdims=True)
        return g * (y - m) / jnp.sqrt(v + BN_EPS) + b

    h = jnp.einsum("nlc,cd->nld", x, p["w1"]) + p["b1"]
    h = jax.nn.relu(bn(h, p["g1"], p["be1"]))

    zero = jnp.zeros_like(h[:, :1, :])
    hm1 = jnp.concatenate([zero, h[:, :-1, :]], axis=1)
    hp1 = jnp.concatenate([h[:, 1:, :], zero], axis=1)
    h = (jnp.einsum("nlc,cd->nld", hm1, p["w2"][0])
         + jnp.einsum("nlc,cd->nld", h, p["w2"][1])
         + jnp.einsum("nlc,cd->nld", hp1, p["w2"][2])
         + p["b2"])
    h = jax.nn.relu(bn(h, p["g2"], p["be2"]))

    h = jnp.einsum("nlc,cd->nld", h, p["w3"]) + p["b3"]
    h = bn(h, p["g3"], p["be3"])
    return jax.nn.relu(h + x)


def reslayer_reference(x_ncl, blocks):
    x = jnp.transpose(x_ncl, (0, 2, 1)).astype(jnp.float32)
    for p in blocks:
        x = _resblock_reference_nlc(x, p)
    return jnp.transpose(x, (0, 2, 1))


def make_params(key, in_channels, out_channels):
    """Synthetic parameters (NLC-layout weights, per-channel vectors).

    w2[k, ci, co] corresponds to the PyTorch conv2 weight W[co, ci, k]
    (tap k=0 pairs with input position l-1).  Conv biases b1/b2/b3 are kept
    for the reference only; the kernel drops them (bias before batch-stats BN
    cancels exactly)."""
    c_mid = out_channels
    c_out = out_channels * 4
    ks = jax.random.split(key, 12)

    def w(k, shape, fan_in):
        return jax.random.normal(k, shape, jnp.float32) / jnp.sqrt(fan_in)

    def v(k, c, base=0.0):
        return base + 0.1 * jax.random.normal(k, (c,), jnp.float32)

    return {
        "w1": w(ks[0], (in_channels, c_mid), in_channels),
        "b1": v(ks[1], c_mid),
        "g1": v(ks[2], c_mid, base=1.0),
        "be1": v(ks[3], c_mid),
        "w2": w(ks[4], (3, c_mid, c_mid), 3 * c_mid),
        "b2": v(ks[5], c_mid),
        "g2": v(ks[6], c_mid, base=1.0),
        "be2": v(ks[7], c_mid),
        "w3": w(ks[8], (c_mid, c_out), c_mid),
        "b3": v(ks[9], c_out),
        "g3": v(ks[10], c_out, base=1.0),
        "be3": v(ks[11], c_out),
    }


if __name__ == "__main__":
    # Shapes consistent with ResUNet's bottleneck blocks (stride=1,
    # identity_downsample=None, in_channels == 4 * intermediate_channels).
    # Small but lane-friendly: C_in = C_out = 128, C_mid = 32.
    N, C_IN, L = 2, 128, 64
    C_MID = 32
    NUM_BLOCKS = 2          # a _make_layer-style chain (exercises the fusion)

    key = jax.random.PRNGKey(0)
    k_x, k_p = jax.random.split(key)
    x = jax.random.normal(k_x, (N, C_IN, L), jnp.float32)   # PyTorch NCL input
    blocks = [make_params(k, C_IN, C_MID)
              for k in jax.random.split(k_p, NUM_BLOCKS)]

    # ---- single block, f32 everywhere (tight check) ----
    ref1 = jax.block_until_ready(reslayer_reference(x, blocks[:1]))
    fwd1 = jax.jit(functools.partial(
        resblock_forward_ncl, act_dtype=jnp.float32, matmul_dtype=jnp.float32))
    out1 = jax.block_until_ready(fwd1(x, blocks[0]))
    assert out1.shape == (N, 4 * C_MID, L), out1.shape
    err1 = float(jnp.max(jnp.abs(out1 - ref1)))
    assert err1 < 5e-3, f"single-block f32 mismatch: max abs err = {err1}"

    # ---- 2-block chained layer, f32 (exercises fused pass4 + next conv1) ----
    ref2 = jax.block_until_ready(reslayer_reference(x, blocks))
    fwd2 = jax.jit(functools.partial(
        reslayer_forward_ncl, act_dtype=jnp.float32, matmul_dtype=jnp.float32))
    out2 = jax.block_until_ready(fwd2(x, blocks))
    err2 = float(jnp.max(jnp.abs(out2 - ref2)))
    assert err2 < 1e-2, f"layer f32 mismatch: max abs err = {err2}"

    # ---- 2-block chained layer, default bf16 activations + bf16 matmuls ----
    fwd_bf = jax.jit(reslayer_forward_ncl)
    out_bf = jax.block_until_ready(fwd_bf(x, blocks))
    err_max = float(jnp.max(jnp.abs(out_bf - ref2)))
    err_mean = float(jnp.mean(jnp.abs(out_bf - ref2)))
    assert err_max < 1.0 and err_mean < 0.05, (err_max, err_mean)

    print("KERNEL_OK")
</pallas_src>

<mosaic_0001>
module attributes {stable_mosaic.version = 11 : i64} {
  func.func @_bn_conv1_stats_kernel(%arg0: i32, %arg1: memref<2x1x32xf32, #tpu.memory_space<vmem>>, %arg2: memref<2x1x32xf32, #tpu.memory_space<vmem>>, %arg3: memref<1x32xf32, #tpu.memory_space<vmem>>, %arg4: memref<1x32xf32, #tpu.memory_space<vmem>>, %arg5: memref<2x32x32xf32, #tpu.memory_space<vmem>>, %arg6: memref<32x128xf32, #tpu.memory_space<vmem>>, %arg7: memref<2x32x128xf32, #tpu.memory_space<vmem>>, %arg8: memref<1x1x128xf32, #tpu.memory_space<vmem>>, %arg9: memref<1x1x128xf32, #tpu.memory_space<vmem>>) attributes {dimension_semantics = [#tpu.dimension_semantics<parallel>], iteration_bounds = array<i64: 2>, scalar_prefetch = 0 : i64, scratch_operands = 0 : i64, tpu.core_type = #tpu.core_type<tc>, window_params = [{pipeline_mode = #tpu.pipeline_mode<synchronous>, transform_indices = @transform_0, window_bounds = array<i64: 2, 1, 32>}, {pipeline_mode = #tpu.pipeline_mode<synchronous>, transform_indices = @transform_1, window_bounds = array<i64: 2, 1, 32>}, {pipeline_mode = #tpu.pipeline_mode<synchronous>, transform_indices = @transform_2, window_bounds = array<i64: 1, 32>}, {pipeline_mode = #tpu.pipeline_mode<synchronous>, transform_indices = @transform_3, window_bounds = array<i64: 1, 32>}, {transform_indices = @transform_4, window_bounds = array<i64: 2, 32, 32>}, {pipeline_mode = #tpu.pipeline_mode<synchronous>, transform_indices = @transform_5, window_bounds = array<i64: 32, 128>}, {transform_indices = @transform_6, window_bounds = array<i64: 2, 32, 128>}, {transform_indices = @transform_7, window_bounds = array<i64: 1, 1, 128>}, {transform_indices = @transform_8, window_bounds = array<i64: 1, 1, 128>}]} {
    %c0 = arith.constant 0 : index
    %c0_0 = arith.constant 0 : index
    %c0_1 = arith.constant 0 : index
    %0 = vector.load %arg1[%c0, %c0_0, %c0_1] : memref<2x1x32xf32, #tpu.memory_space<vmem>>, vector<2x1x32xf32>
    %cst = arith.constant dense<0.000000e+00> : vector<1x32xf32>
    %1 = vector.multi_reduction <add>, %0, %cst [0] : vector<2x1x32xf32> to vector<1x32xf32>
    %c0_2 = arith.constant 0 : index
    %c0_3 = arith.constant 0 : index
    %c0_4 = arith.constant 0 : index
    %2 = vector.load %arg2[%c0_2, %c0_3, %c0_4] : memref<2x1x32xf32, #tpu.memory_space<vmem>>, vector<2x1x32xf32>
    %cst_5 = arith.constant dense<0.000000e+00> : vector<1x32xf32>
    %3 = vector.multi_reduction <add>, %2, %cst_5 [0] : vector<2x1x32xf32> to vector<1x32xf32>
    %cst_6 = arith.constant 7.812500e-03 : f32
    %4 = vector.broadcast %cst_6 : f32 to vector<1x32xf32>
    %5 = arith.mulf %1, %4 : vector<1x32xf32>
    %cst_7 = arith.constant 7.812500e-03 : f32
    %6 = vector.broadcast %cst_7 : f32 to vector<1x32xf32>
    %7 = arith.mulf %3, %6 : vector<1x32xf32>
    %8 = arith.mulf %5, %5 : vector<1x32xf32>
    %9 = arith.subf %7, %8 : vector<1x32xf32>
    %cst_8 = arith.constant 0.000000e+00 : f32
    %10 = vector.broadcast %cst_8 : f32 to vector<1x32xf32>
    %11 = arith.maximumf %9, %10 : vector<1x32xf32>
    %c0_9 = arith.constant 0 : index
    %c0_10 = arith.constant 0 : index
    %12 = vector.load %arg3[%c0_9, %c0_10] : memref<1x32xf32, #tpu.memory_space<vmem>>, vector<1x32xf32>
    %cst_11 = arith.constant 9.99999974E-6 : f32
    %13 = vector.broadcast %cst_11 : f32 to vector<1x32xf32>
    %14 = arith.addf %11, %13 : vector<1x32xf32>
    %15 = math.rsqrt %14 : vector<1x32xf32>
    %16 = arith.mulf %12, %15 : vector<1x32xf32>
    %c0_12 = arith.constant 0 : index
    %c0_13 = arith.constant 0 : index
    %17 = vector.load %arg4[%c0_12, %c0_13] : memref<1x32xf32, #tpu.memory_space<vmem>>, vector<1x32xf32>
    %18 = arith.mulf %5, %16 : vector<1x32xf32>
    %19 = arith.subf %17, %18 : vector<1x32xf32>
    %c0_14 = arith.constant 0 : index
    %c0_15 = arith.constant 0 : index
    %c0_16 = arith.constant 0 : index
    %20 = vector.load %arg5[%c0_14, %c0_15, %c0_16] : memref<2x32x32xf32, #tpu.memory_space<vmem>>, vector<2x32x32xf32>
    %21 = vector.shape_cast %16 : vector<1x32xf32> to vector<1x1x32xf32>
    %22 = vector.broadcast %21 : vector<1x1x32xf32> to vector<2x32x32xf32>
    %23 = arith.mulf %22, %20 : vector<2x32x32xf32>
    %24 = vector.shape_cast %19 : vector<1x32xf32> to vector<1x1x32xf32>
    %25 = vector.broadcast %24 : vector<1x1x32xf32> to vector<2x32x32xf32>
    %26 = arith.addf %23, %25 : vector<2x32x32xf32>
    %cst_17 = arith.constant 0.000000e+00 : f32
    %27 = vector.broadcast %cst_17 : f32 to vector<2x32x32xf32>
    %28 = arith.maximumf %26, %27 : vector<2x32x32xf32>
    %29 = vector.shape_cast %28 : vector<2x32x32xf32> to vector<64x32xf32>
    %c0_18 = arith.constant 0 : index
    %c0_19 = arith.constant 0 : index
    %30 = vector.load %arg6[%c0_18, %c0_19] : memref<32x128xf32, #tpu.memory_space<vmem>>, vector<32x128xf32>
    %cst_20 = arith.constant dense<0.000000e+00> : vector<64x128xf32>
    %31 = tpu.matmul %29, %30, %cst_20 {dimension_numbers = #tpu.dot_dimension_numbers<[1], [0], [0], [1], [0, 0, 1, 1], [], []>} : vector<64x32xf32>, vector<32x128xf32>, vector<64x128xf32> -> vector<64x128xf32>
    %32 = vector.shape_cast %31 : vector<64x128xf32> to vector<2x32x128xf32>
    %c0_21 = arith.constant 0 : index
    %c0_22 = arith.constant 0 : index
    %c0_23 = arith.constant 0 : index
    %33 = vector.load %arg7[%c0_21, %c0_22, %c0_23] : memref<2x32x128xf32, #tpu.memory_space<vmem>>, vector<2x32x128xf32>
    tpu.vector_store %arg7[%c0_21, %c0_22, %c0_23], %32 {strides = array<i32>} : memref<2x32x128xf32, #tpu.memory_space<vmem>>, vector<2x32x128xf32>,
    %cst_24 = arith.constant dense<0.000000e+00> : vector<128xf32>
    %34 = vector.multi_reduction <add>, %31, %cst_24 [0] : vector<64x128xf32> to vector<128xf32>
    %35 = vector.shape_cast %34 : vector<128xf32> to vector<1x128xf32>
    %36 = vector.shape_cast %35 : vector<1x128xf32> to vector<1x1x128xf32>
    %c0_25 = arith.constant 0 : index
    %c0_26 = arith.constant 0 : index
    %c0_27 = arith.constant 0 : index
    %37 = vector.load %arg8[%c0_25, %c0_26, %c0_27] : memref<1x1x128xf32, #tpu.memory_space<vmem>>, vector<1x1x128xf32>
    tpu.vector_store %arg8[%c0_25, %c0_26, %c0_27], %36 {strides = array<i32>} : memref<1x1x128xf32, #tpu.memory_space<vmem>>, vector<1x1x128xf32>,
    %38 = arith.mulf %31, %31 : vector<64x128xf32>
    %cst_28 = arith.constant dense<0.000000e+00> : vector<128xf32>
    %39 = vector.multi_reduction <add>, %38, %cst_28 [0] : vector<64x128xf32> to vector<128xf32>
    %40 = vector.shape_cast %39 : vector<128xf32> to vector<1x128xf32>
    %41 = vector.shape_cast %40 : vector<1x128xf32> to vector<1x1x128xf32>
    %c0_29 = arith.constant 0 : index
    %c0_30 = arith.constant 0 : index
    %c0_31 = arith.constant 0 : index
    %42 = vector.load %arg9[%c0_29, %c0_30, %c0_31] : memref<1x1x128xf32, #tpu.memory_space<vmem>>, vector<1x1x128xf32>
    tpu.vector_store %arg9[%c0_29, %c0_30, %c0_31], %41 {strides = array<i32>} : memref<1x1x128xf32, #tpu.memory_space<vmem>>, vector<1x1x128xf32>,
    return
  }
  func.func @transform_0(%arg0: i32) -> (i32, i32, i32) {
    %c0_i32 = arith.constant 0 : i32
    %c0_i32_0 = arith.constant 0 : i32
    %c0_i32_1 = arith.constant 0 : i32
    %c0_i32_2 = arith.constant 0 : i32
    return %c0_i32, %c0_i32_0, %c0_i32_1 : i32, i32, i32
  }
  func.func @transform_1(%arg0: i32) -> (i32, i32, i32) {
    %c0_i32 = arith.constant 0 : i32
    %c0_i32_0 = arith.constant 0 : i32
    %c0_i32_1 = arith.constant 0 : i32
    %c0_i32_2 = arith.constant 0 : i32
    return %c0_i32, %c0_i32_0, %c0_i32_1 : i32, i32, i32
  }
  func.func @transform_2(%arg0: i32) -> (i32, i32) {
    %c0_i32 = arith.constant 0 : i32
    %c0_i32_0 = arith.constant 0 : i32
    %c0_i32_1 = arith.constant 0 : i32
    return %c0_i32, %c0_i32_0 : i32, i32
  }
  func.func @transform_3(%arg0: i32) -> (i32, i32) {
    %c0_i32 = arith.constant 0 : i32
    %c0_i32_0 = arith.constant 0 : i32
    %c0_i32_1 = arith.constant 0 : i32
    return %c0_i32, %c0_i32_0 : i32, i32
  }
  func.func @transform_4(%arg0: i32) -> (i32, i32, i32) {
    %c0_i32 = arith.constant 0 : i32
    %c0_i32_0 = arith.constant 0 : i32
    %c0_i32_1 = arith.constant 0 : i32
    return %c0_i32, %arg0, %c0_i32_0 : i32, i32, i32
  }
  func.func @transform_5(%arg0: i32) -> (i32, i32) {
    %c0_i32 = arith.constant 0 : i32
    %c0_i32_0 = arith.constant 0 : i32
    %c0_i32_1 = arith.constant 0 : i32
    return %c0_i32, %c0_i32_0 : i32, i32
  }
  func.func @transform_6(%arg0: i32) -> (i32, i32, i32) {
    %c0_i32 = arith.constant 0 : i32
    %c0_i32_0 = arith.constant 0 : i32
    %c0_i32_1 = arith.constant 0 : i32
    return %c0_i32, %arg0, %c0_i32_0 : i32, i32, i32
  }
  func.func @transform_7(%arg0: i32) -> (i32, i32, i32) {
    %c0_i32 = arith.constant 0 : i32
    %c0_i32_0 = arith.constant 0 : i32
    %c0_i32_1 = arith.constant 0 : i32
    return %arg0, %c0_i32, %c0_i32_0 : i32, i32, i32
  }
  func.func @transform_8(%arg0: i32) -> (i32, i32, i32) {
    %c0_i32 = arith.constant 0 : i32
    %c0_i32_0 = arith.constant 0 : i32
    %c0_i32_1 = arith.constant 0 : i32
    return %arg0, %c0_i32, %c0_i32_0 : i32, i32, i32
  }
}

module attributes {stable_mosaic.version = 11 : i64} {
  func.func @_conv1_stats_kernel(%arg0: i32, %arg1: memref<2x32x128xf32, #tpu.memory_space<vmem>>, %arg2: memref<128x32xf32, #tpu.memory_space<vmem>>, %arg3: memref<2x32x32xf32, #tpu.memory_space<vmem>>, %arg4: memref<1x1x32xf32, #tpu.memory_space<vmem>>, %arg5: memref<1x1x32xf32, #tpu.memory_space<vmem>>) attributes {dimension_semantics = [#tpu.dimension_semantics<parallel>], iteration_bounds = array<i64: 2>, scalar_prefetch = 0 : i64, scratch_operands = 0 : i64, tpu.core_type = #tpu.core_type<tc>, window_params = [{transform_indices = @transform_0, window_bounds = array<i64: 2, 32, 128>}, {pipeline_mode = #tpu.pipeline_mode<synchronous>, transform_indices = @transform_1, window_bounds = array<i64: 128, 32>}, {transform_indices = @transform_2, window_bounds = array<i64: 2, 32, 32>}, {transform_indices = @transform_3, window_bounds = array<i64: 1, 1, 32>}, {transform_indices = @transform_4, window_bounds = array<i64: 1, 1, 32>}]} {
    %c0 = arith.constant 0 : index
    %c0_0 = arith.constant 0 : index
    %c0_1 = arith.constant 0 : index
    %0 = vector.load %arg1[%c0, %c0_0, %c0_1] : memref<2x32x128xf32, #tpu.memory_space<vmem>>, vector<2x32x128xf32>
    %1 = vector.shape_cast %0 : vector<2x32x128xf32> to vector<64x128xf32>
    %c0_2 = arith.constant 0 : index
    %c0_3 = arith.constant 0 : index
    %2 = vector.load %arg2[%c0_2, %c0_3] : memref<128x32xf32, #tpu.memory_space<vmem>>, vector<128x32xf32>
    %cst = arith.constant dense<0.000000e+00> : vector<64x32xf32>
    %3 = tpu.matmul %1, %2, %cst {dimension_numbers = #tpu.dot_dimension_numbers<[1], [0], [0], [1], [0, 0, 1, 1], [], []>} : vector<64x128xf32>, vector<128x32xf32>, vector<64x32xf32> -> vector<64x32xf32>
    %4 = vector.shape_cast %3 : vector<64x32xf32> to vector<2x32x32xf32>
    %c0_4 = arith.constant 0 : index
    %c0_5 = arith.constant 0 : index
    %c0_6 = arith.constant 0 : index
    %5 = vector.load %arg3[%c0_4, %c0_5, %c0_6] : memref<2x32x32xf32, #tpu.memory_space<vmem>>, vector<2x32x32xf32>
    tpu.vector_store %arg3[%c0_4, %c0_5, %c0_6], %4 {strides = array<i32>} : memref<2x32x32xf32, #tpu.memory_space<vmem>>, vector<2x32x32xf32>,
    %cst_7 = arith.constant dense<0.000000e+00> : vector<32xf32>
    %6 = vector.multi_reduction <add>, %3, %cst_7 [0] : vector<64x32xf32> to vector<32xf32>
    %7 = vector.shape_cast %6 : vector<32xf32> to vector<1x32xf32>
    %8 = vector.shape_cast %7 : vector<1x32xf32> to vector<1x1x32xf32>
    %c0_8 = arith.constant 0 : index
    %c0_9 = arith.constant 0 : index
    %c0_10 = arith.constant 0 : index
    %9 = vector.load %arg4[%c0_8, %c0_9, %c0_10] : memref<1x1x32xf32, #tpu.memory_space<vmem>>, vector<1x1x32xf32>
    tpu.vector_store %arg4[%c0_8, %c0_9, %c0_10], %8 {strides = array<i32>} : memref<1x1x32xf32, #tpu.memory_space<vmem>>, vector<1x1x32xf32>,
    %10 = arith.mulf %3, %3 : vector<64x32xf32>
    %cst_11 = arith.constant dense<0.000000e+00> : vector<32xf32>
    %11 = vector.multi_reduction <add>, %10, %cst_11 [0] : vector<64x32xf32> to vector<32xf32>
    %12 = vector.shape_cast %11 : vector<32xf32> to vector<1x32xf32>
    %13 = vector.shape_cast %12 : vector<1x32xf32> to vector<1x1x32xf32>
    %c0_12 = arith.constant 0 : index
    %c0_13 = arith.constant 0 : index
    %c0_14 = arith.constant 0 : index
    %14 = vector.load %arg5[%c0_12, %c0_13, %c0_14] : memref<1x1x32xf32, #tpu.memory_space<vmem>>, vector<1x1x32xf32>
    tpu.vector_store %arg5[%c0_12, %c0_13, %c0_14], %13 {strides = array<i32>} : memref<1x1x32xf32, #tpu.memory_space<vmem>>, vector<1x1x32xf32>,
    return
  }
  func.func @transform_0(%arg0: i32) -> (i32, i32, i32) {
    %c0_i32 = arith.constant 0 : i32
    %c0_i32_0 = arith.constant 0 : i32
    %c0_i32_1 = arith.constant 0 : i32
    return %c0_i32, %arg0, %c0_i32_0 : i32, i32, i32
  }
  func.func @transform_1(%arg0: i32) -> (i32, i32) {
    %c0_i32 = arith.constant 0 : i32
    %c0_i32_0 = arith.constant 0 : i32
    %c0_i32_1 = arith.constant 0 : i32
    return %c0_i32, %c0_i32_0 : i32, i32
  }
  func.func @transform_2(%arg0: i32) -> (i32, i32, i32) {
    %c0_i32 = arith.constant 0 : i32
    %c0_i32_0 = arith.constant 0 : i32
    %c0_i32_1 = arith.constant 0 : i32
    return %c0_i32, %arg0, %c0_i32_0 : i32, i32, i32
  }
  func.func @transform_3(%arg0: i32) -> (i32, i32, i32) {
    %c0_i32 = arith.constant 0 : i32
    %c0_i32_0 = arith.constant 0 : i32
    %c0_i32_1 = arith.constant 0 : i32
    return %arg0, %c0_i32, %c0_i32_0 : i32, i32, i32
  }
  func.func @transform_4(%arg0: i32) -> (i32, i32, i32) {
    %c0_i32 = arith.constant 0 : i32
    %c0_i32_0 = arith.constant 0 : i32
    %c0_i32_1 = arith.constant 0 : i32
    return %arg0, %c0_i32, %c0_i32_0 : i32, i32, i32
  }
}

module attributes {stable_mosaic.version = 11 : i64} {
  func.func @_bn_conv3_stats_kernel(%arg0: i32, %arg1: memref<2x1x32xf32, #tpu.memory_space<vmem>>, %arg2: memref<2x1x32xf32, #tpu.memory_space<vmem>>, %arg3: memref<1x32xf32, #tpu.memory_space<vmem>>, %arg4: memref<1x32xf32, #tpu.memory_space<vmem>>, %arg5: memref<2x32x32xf32, #tpu.memory_space<vmem>>, %arg6: memref<2x8x32xf32, #tpu.memory_space<vmem>>, %arg7: memref<2x8x32xf32, #tpu.memory_space<vmem>>, %arg8: memref<3x32x32xf32, #tpu.memory_space<vmem>>, %arg9: memref<2x32x32xf32, #tpu.memory_space<vmem>>, %arg10: memref<1x1x32xf32, #tpu.memory_space<vmem>>, %arg11: memref<1x1x32xf32, #tpu.memory_space<vmem>>) attributes {dimension_semantics = [#tpu.dimension_semantics<parallel>], iteration_bounds = array<i64: 2>, scalar_prefetch = 0 : i64, scratch_operands = 0 : i64, tpu.core_type = #tpu.core_type<tc>, window_params = [{pipeline_mode = #tpu.pipeline_mode<synchronous>, transform_indices = @transform_0, window_bounds = array<i64: 2, 1, 32>}, {pipeline_mode = #tpu.pipeline_mode<synchronous>, transform_indices = @transform_1, window_bounds = array<i64: 2, 1, 32>}, {pipeline_mode = #tpu.pipeline_mode<synchronous>, transform_indices = @transform_2, window_bounds = array<i64: 1, 32>}, {pipeline_mode = #tpu.pipeline_mode<synchronous>, transform_indices = @transform_3, window_bounds = array<i64: 1, 32>}, {transform_indices = @transform_4, window_bounds = array<i64: 2, 32, 32>}, {transform_indices = @transform_5, window_bounds = array<i64: 2, 8, 32>}, {transform_indices = @transform_6, window_bounds = array<i64: 2, 8, 32>}, {pipeline_mode = #tpu.pipeline_mode<synchronous>, transform_indices = @transform_7, window_bounds = array<i64: 3, 32, 32>}, {transform_indices = @transform_8, window_bounds = array<i64: 2, 32, 32>}, {transform_indices = @transform_9, window_bounds = array<i64: 1, 1, 32>}, {transform_indices = @transform_10, window_bounds = array<i64: 1, 1, 32>}]} {
    %c0 = arith.constant 0 : index
    %c0_0 = arith.constant 0 : index
    %c0_1 = arith.constant 0 : index
    %0 = vector.load %arg1[%c0, %c0_0, %c0_1] : memref<2x1x32xf32, #tpu.memory_space<vmem>>, vector<2x1x32xf32>
    %cst = arith.constant dense<0.000000e+00> : vector<1x32xf32>
    %1 = vector.multi_reduction <add>, %0, %cst [0] : vector<2x1x32xf32> to vector<1x32xf32>
    %c0_2 = arith.constant 0 : index
    %c0_3 = arith.constant 0 : index
    %c0_4 = arith.constant 0 : index
    %2 = vector.load %arg2[%c0_2, %c0_3, %c0_4] : memref<2x1x32xf32, #tpu.memory_space<vmem>>, vector<2x1x32xf32>
    %cst_5 = arith.constant dense<0.000000e+00> : vector<1x32xf32>
    %3 = vector.multi_reduction <add>, %2, %cst_5 [0] : vector<2x1x32xf32> to vector<1x32xf32>
    %cst_6 = arith.constant 7.812500e-03 : f32
    %4 = vector.broadcast %cst_6 : f32 to vector<1x32xf32>
    %5 = arith.mulf %1, %4 : vector<1x32xf32>
    %cst_7 = arith.constant 7.812500e-03 : f32
    %6 = vector.broadcast %cst_7 : f32 to vector<1x32xf32>
    %7 = arith.mulf %3, %6 : vector<1x32xf32>
    %8 = arith.mulf %5, %5 : vector<1x32xf32>
    %9 = arith.subf %7, %8 : vector<1x32xf32>
    %cst_8 = arith.constant 0.000000e+00 : f32
    %10 = vector.broadcast %cst_8 : f32 to vector<1x32xf32>
    %11 = arith.maximumf %9, %10 : vector<1x32xf32>
    %c0_9 = arith.constant 0 : index
    %c0_10 = arith.constant 0 : index
    %12 = vector.load %arg3[%c0_9, %c0_10] : memref<1x32xf32, #tpu.memory_space<vmem>>, vector<1x32xf32>
    %cst_11 = arith.constant 9.99999974E-6 : f32
    %13 = vector.broadcast %cst_11 : f32 to vector<1x32xf32>
    %14 = arith.addf %11, %13 : vector<1x32xf32>
    %15 = math.rsqrt %14 : vector<1x32xf32>
    %16 = arith.mulf %12, %15 : vector<1x32xf32>
    %c0_12 = arith.constant 0 : index
    %c0_13 = arith.constant 0 : index
    %17 = vector.load %arg4[%c0_12, %c0_13] : memref<1x32xf32, #tpu.memory_space<vmem>>, vector<1x32xf32>
    %18 = arith.mulf %5, %16 : vector<1x32xf32>
    %19 = arith.subf %17, %18 : vector<1x32xf32>
    %c0_14 = arith.constant 0 : index
    %c0_15 = arith.constant 0 : index
    %c0_16 = arith.constant 0 : index
    %20 = vector.load %arg5[%c0_14, %c0_15, %c0_16] : memref<2x32x32xf32, #tpu.memory_space<vmem>>, vector<2x32x32xf32>
    %21 = vector.shape_cast %16 : vector<1x32xf32> to vector<1x1x32xf32>
    %22 = vector.broadcast %21 : vector<1x1x32xf32> to vector<2x32x32xf32>
    %23 = arith.mulf %22, %20 : vector<2x32x32xf32>
    %24 = vector.shape_cast %19 : vector<1x32xf32> to vector<1x1x32xf32>
    %25 = vector.broadcast %24 : vector<1x1x32xf32> to vector<2x32x32xf32>
    %26 = arith.addf %23, %25 : vector<2x32x32xf32>
    %cst_17 = arith.constant 0.000000e+00 : f32
    %27 = vector.broadcast %cst_17 : f32 to vector<2x32x32xf32>
    %28 = arith.maximumf %26, %27 : vector<2x32x32xf32>
    %c0_18 = arith.constant 0 : index
    %c7 = arith.constant 7 : index
    %c0_19 = arith.constant 0 : index
    %29 = vector.load %arg6[%c0_18, %c7, %c0_19] : memref<2x8x32xf32, #tpu.memory_space<vmem>>, vector<2x1x32xf32>
    %30 = vector.shape_cast %16 : vector<1x32xf32> to vector<1x1x32xf32>
    %31 = vector.broadcast %30 : vector<1x1x32xf32> to vector<2x1x32xf32>
    %32 = arith.mulf %31, %29 : vector<2x1x32xf32>
    %33 = vector.shape_cast %19 : vector<1x32xf32> to vector<1x1x32xf32>
    %34 = vector.broadcast %33 : vector<1x1x32xf32> to vector<2x1x32xf32>
    %35 = arith.addf %32, %34 : vector<2x1x32xf32>
    %cst_20 = arith.constant 0.000000e+00 : f32
    %36 = vector.broadcast %cst_20 : f32 to vector<2x1x32xf32>
    %37 = arith.maximumf %35, %36 : vector<2x1x32xf32>
    %c0_i32 = arith.constant 0 : i32
    %38 = arith.cmpi sgt, %arg0, %c0_i32 : i32
    %39 = arith.extui %38 : i1 to i32
    %40 = arith.sitofp %39 : i32 to f32
    %41 = vector.broadcast %40 : f32 to vector<2x1x32xf32>
    %42 = arith.mulf %37, %41 : vector<2x1x32xf32>
    %c0_21 = arith.constant 0 : index
    %c0_22 = arith.constant 0 : index
    %c0_23 = arith.constant 0 : index
    %43 = vector.load %arg7[%c0_21, %c0_22, %c0_23] : memref<2x8x32xf32, #tpu.memory_space<vmem>>, vector<2x1x32xf32>
    %44 = vector.shape_cast %16 : vector<1x32xf32> to vector<1x1x32xf32>
    %45 = vector.broadcast %44 : vector<1x1x32xf32> to vector<2x1x32xf32>
    %46 = arith.mulf %45, %43 : vector<2x1x32xf32>
    %47 = vector.shape_cast %19 : vector<1x32xf32> to vector<1x1x32xf32>
    %48 = vector.broadcast %47 : vector<1x1x32xf32> to vector<2x1x32xf32>
    %49 = arith.addf %46, %48 : vector<2x1x32xf32>
    %cst_24 = arith.constant 0.000000e+00 : f32
    %50 = vector.broadcast %cst_24 : f32 to vector<2x1x32xf32>
    %51 = arith.maximumf %49, %50 : vector<2x1x32xf32>
    %c1_i32 = arith.constant 1 : i32
    %52 = arith.cmpi slt, %arg0, %c1_i32 : i32
    %53 = arith.extui %52 : i1 to i32
    %54 = arith.sitofp %53 : i32 to f32
    %55 = vector.broadcast %54 : f32 to vector<2x1x32xf32>
    %56 = arith.mulf %51, %55 : vector<2x1x32xf32>
    %57 = vector.extract_strided_slice %28 {offsets = [0, 0, 0], sizes = [2, 31, 32], strides = [1, 1, 1]} : vector<2x32x32xf32> to vector<2x31x32xf32>
    %58 = tpu.concatenate %42, %57 in 1 : vector<2x1x32xf32>, vector<2x31x32xf32> -> vector<2x32x32xf32>
    %59 = vector.extract_strided_slice %28 {offsets = [0, 1, 0], sizes = [2, 31, 32], strides = [1, 1, 1]} : vector<2x32x32xf32> to vector<2x31x32xf32>
    %60 = tpu.concatenate %59, %56 in 1 : vector<2x31x32xf32>, vector<2x1x32xf32> -> vector<2x32x32xf32>
    %61 = vector.shape_cast %28 : vector<2x32x32xf32> to vector<64x32xf32>
    %c1 = arith.constant 1 : index
    %c0_25 = arith.constant 0 : index
    %c0_26 = arith.constant 0 : index
    %62 = vector.load %arg8[%c1, %c0_25, %c0_26] : memref<3x32x32xf32, #tpu.memory_space<vmem>>, vector<1x32x32xf32>
    %63 = vector.shape_cast %62 : vector<1x32x32xf32> to vector<32x32xf32>
    %cst_27 = arith.constant dense<0.000000e+00> : vector<64x32xf32>
    %64 = tpu.matmul %61, %63, %cst_27 {dimension_numbers = #tpu.dot_dimension_numbers<[1], [0], [0], [1], [0, 0, 1, 1], [], []>} : vector<64x32xf32>, vector<32x32xf32>, vector<64x32xf32> -> vector<64x32xf32>
    %65 = vector.shape_cast %58 : vector<2x32x32xf32> to vector<64x32xf32>
    %c0_28 = arith.constant 0 : index
    %c0_29 = arith.constant 0 : index
    %c0_30 = arith.constant 0 : index
    %66 = vector.load %arg8[%c0_28, %c0_29, %c0_30] : memref<3x32x32xf32, #tpu.memory_space<vmem>>, vector<1x32x32xf32>
    %67 = vector.shape_cast %66 : vector<1x32x32xf32> to vector<32x32xf32>
    %cst_31 = arith.constant dense<0.000000e+00> : vector<64x32xf32>
    %68 = tpu.matmul %65, %67, %cst_31 {dimension_numbers = #tpu.dot_dimension_numbers<[1], [0], [0], [1], [0, 0, 1, 1], [], []>} : vector<64x32xf32>, vector<32x32xf32>, vector<64x32xf32> -> vector<64x32xf32>
    %69 = arith.addf %64, %68 : vector<64x32xf32>
    %70 = vector.shape_cast %60 : vector<2x32x32xf32> to vector<64x32xf32>
    %c2 = arith.constant 2 : index
    %c0_32 = arith.constant 0 : index
    %c0_33 = arith.constant 0 : index
    %71 = vector.load %arg8[%c2, %c0_32, %c0_33] : memref<3x32x32xf32, #tpu.memory_space<vmem>>, vector<1x32x32xf32>
    %72 = vector.shape_cast %71 : vector<1x32x32xf32> to vector<32x32xf32>
    %cst_34 = arith.constant dense<0.000000e+00> : vector<64x32xf32>
    %73 = tpu.matmul %70, %72, %cst_34 {dimension_numbers = #tpu.dot_dimension_numbers<[1], [0], [0], [1], [0, 0, 1, 1], [], []>} : vector<64x32xf32>, vector<32x32xf32>, vector<64x32xf32> -> vector<64x32xf32>
    %74 = arith.addf %69, %73 : vector<64x32xf32>
    %75 = vector.shape_cast %74 : vector<64x32xf32> to vector<2x32x32xf32>
    %c0_35 = arith.constant 0 : index
    %c0_36 = arith.constant 0 : index
    %c0_37 = arith.constant 0 : index
    %76 = vector.load %arg9[%c0_35, %c0_36, %c0_37] : memref<2x32x32xf32, #tpu.memory_space<vmem>>, vector<2x32x32xf32>
    tpu.vector_store %arg9[%c0_35, %c0_36, %c0_37], %75 {strides = array<i32>} : memref<2x32x32xf32, #tpu.memory_space<vmem>>, vector<2x32x32xf32>,
    %cst_38 = arith.constant dense<0.000000e+00> : vector<32xf32>
    %77 = vector.multi_reduction <add>, %74, %cst_38 [0] : vector<64x32xf32> to vector<32xf32>
    %78 = vector.shape_cast %77 : vector<32xf32> to vector<1x32xf32>
    %79 = vector.shape_cast %78 : vector<1x32xf32> to vector<1x1x32xf32>
    %c0_39 = arith.constant 0 : index
    %c0_40 = arith.constant 0 : index
    %c0_41 = arith.constant 0 : index
    %80 = vector.load %arg10[%c0_39, %c0_40, %c0_41] : memref<1x1x32xf32, #tpu.memory_space<vmem>>, vector<1x1x32xf32>
    tpu.vector_store %arg10[%c0_39, %c0_40, %c0_41], %79 {strides = array<i32>} : memref<1x1x32xf32, #tpu.memory_space<vmem>>, vector<1x1x32xf32>,
    %81 = arith.mulf %74, %74 : vector<64x32xf32>
    %cst_42 = arith.constant dense<0.000000e+00> : vector<32xf32>
    %82 = vector.multi_reduction <add>, %81, %cst_42 [0] : vector<64x32xf32> to vector<32xf32>
    %83 = vector.shape_cast %82 : vector<32xf32> to vector<1x32xf32>
    %84 = vector.shape_cast %83 : vector<1x32xf32> to vector<1x1x32xf32>
    %c0_43 = arith.constant 0 : index
    %c0_44 = arith.constant 0 : index
    %c0_45 = arith.constant 0 : index
    %85 = vector.load %arg11[%c0_43, %c0_44, %c0_45] : memref<1x1x32xf32, #tpu.memory_space<vmem>>, vector<1x1x32xf32>
    tpu.vector_store %arg11[%c0_43, %c0_44, %c0_45], %84 {strides = array<i32>} : memref<1x1x32xf32, #tpu.memory_space<vmem>>, vector<1x1x32xf32>,
    return
  }
  func.func @transform_0(%arg0: i32) -> (i32, i32, i32) {
    %c0_i32 = arith.constant 0 : i32
    %c0_i32_0 = arith.constant 0 : i32
    %c0_i32_1 = arith.constant 0 : i32
    %c0_i32_2 = arith.constant 0 : i32
    return %c0_i32, %c0_i32_0, %c0_i32_1 : i32, i32, i32
  }
  func.func @transform_1(%arg0: i32) -> (i32, i32, i32) {
    %c0_i32 = arith.constant 0 : i32
    %c0_i32_0 = arith.constant 0 : i32
    %c0_i32_1 = arith.constant 0 : i32
    %c0_i32_2 = arith.constant 0 : i32
    return %c0_i32, %c0_i32_0, %c0_i32_1 : i32, i32, i32
  }
  func.func @transform_2(%arg0: i32) -> (i32, i32) {
    %c0_i32 = arith.constant 0 : i32
    %c0_i32_0 = arith.constant 0 : i32
    %c0_i32_1 = arith.constant 0 : i32
    return %c0_i32, %c0_i32_0 : i32, i32
  }
  func.func @transform_3(%arg0: i32) -> (i32, i32) {
    %c0_i32 = arith.constant 0 : i32
    %c0_i32_0 = arith.constant 0 : i32
    %c0_i32_1 = arith.constant 0 : i32
    return %c0_i32, %c0_i32_0 : i32, i32
  }
  func.func @transform_4(%arg0: i32) -> (i32, i32, i32) {
    %c0_i32 = arith.constant 0 : i32
    %c0_i32_0 = arith.constant 0 : i32
    %c0_i32_1 = arith.constant 0 : i32
    return %c0_i32, %arg0, %c0_i32_0 : i32, i32, i32
  }
  func.func @transform_5(%arg0: i32) -> (i32, i32, i32) {
    %c4_i32 = arith.constant 4 : i32
    %0 = arith.muli %arg0, %c4_i32 : i32
    %c1_i32 = arith.constant 1 : i32
    %1 = arith.subi %0, %c1_i32 : i32
    %c0_i32 = arith.constant 0 : i32
    %2 = arith.maxsi %1, %c0_i32 : i32
    %c0_i32_0 = arith.constant 0 : i32
    %c0_i32_1 = arith.constant 0 : i32
    %c0_i32_2 = arith.constant 0 : i32
    return %c0_i32_0, %2, %c0_i32_1 : i32, i32, i32
  }
  func.func @transform_6(%arg0: i32) -> (i32, i32, i32) {
    %c1_i32 = arith.constant 1 : i32
    %0 = arith.addi %arg0, %c1_i32 : i32
    %c4_i32 = arith.constant 4 : i32
    %1 = arith.muli %0, %c4_i32 : i32
    %c7_i32 = arith.constant 7 : i32
    %2 = arith.minsi %1, %c7_i32 : i32
    %c0_i32 = arith.constant 0 : i32
    %c0_i32_0 = arith.constant 0 : i32
    %c0_i32_1 = arith.constant 0 : i32
    return %c0_i32, %2, %c0_i32_0 : i32, i32, i32
  }
  func.func @transform_7(%arg0: i32) -> (i32, i32, i32) {
    %c0_i32 = arith.constant 0 : i32
    %c0_i32_0 = arith.constant 0 : i32
    %c0_i32_1 = arith.constant 0 : i32
    %c0_i32_2 = arith.constant 0 : i32
    return %c0_i32, %c0_i32_0, %c0_i32_1 : i32, i32, i32
  }
  func.func @transform_8(%arg0: i32) -> (i32, i32, i32) {
    %c0_i32 = arith.constant 0 : i32
    %c0_i32_0 = arith.constant 0 : i32
    %c0_i32_1 = arith.constant 0 : i32
    return %c0_i32, %arg0, %c0_i32_0 : i32, i32, i32
  }
  func.func @transform_9(%arg0: i32) -> (i32, i32, i32) {
    %c0_i32 = arith.constant 0 : i32
    %c0_i32_0 = arith.constant 0 : i32
    %c0_i32_1 = arith.constant 0 : i32
    return %arg0, %c0_i32, %c0_i32_0 : i32, i32, i32
  }
  func.func @transform_10(%arg0: i32) -> (i32, i32, i32) {
    %c0_i32 = arith.constant 0 : i32
    %c0_i32_0 = arith.constant 0 : i32
    %c0_i32_1 = arith.constant 0 : i32
    return %arg0, %c0_i32, %c0_i32_0 : i32, i32, i32
  }
}

module attributes {stable_mosaic.version = 11 : i64} {
  func.func @_bn_res_relu_kernel(%arg0: i32, %arg1: memref<2x1x128xf32, #tpu.memory_space<vmem>>, %arg2: memref<2x1x128xf32, #tpu.memory_space<vmem>>, %arg3: memref<1x128xf32, #tpu.memory_space<vmem>>, %arg4: memref<1x128xf32, #tpu.memory_space<vmem>>, %arg5: memref<2x32x128xf32, #tpu.memory_space<vmem>>, %arg6: memref<2x32x128xf32, #tpu.memory_space<vmem>>, %arg7: memref<2x32x128xf32, #tpu.memory_space<vmem>>) attributes {dimension_semantics = [#tpu.dimension_semantics<parallel>], iteration_bounds = array<i64: 2>, scalar_prefetch = 0 : i64, scratch_operands = 0 : i64, tpu.core_type = #tpu.core_type<tc>, window_params = [{pipeline_mode = #tpu.pipeline_mode<synchronous>, transform_indices = @transform_0, window_bounds = array<i64: 2, 1, 128>}, {pipeline_mode = #tpu.pipeline_mode<synchronous>, transform_indices = @transform_1, window_bounds = array<i64: 2, 1, 128>}, {pipeline_mode = #tpu.pipeline_mode<synchronous>, transform_indices = @transform_2, window_bounds = array<i64: 1, 128>}, {pipeline_mode = #tpu.pipeline_mode<synchronous>, transform_indices = @transform_3, window_bounds = array<i64: 1, 128>}, {transform_indices = @transform_4, window_bounds = array<i64: 2, 32, 128>}, {transform_indices = @transform_5, window_bounds = array<i64: 2, 32, 128>}, {transform_indices = @transform_6, window_bounds = array<i64: 2, 32, 128>}]} {
    %c0 = arith.constant 0 : index
    %c0_0 = arith.constant 0 : index
    %c0_1 = arith.constant 0 : index
    %0 = vector.load %arg1[%c0, %c0_0, %c0_1] : memref<2x1x128xf32, #tpu.memory_space<vmem>>, vector<2x1x128xf32>
    %cst = arith.constant dense<0.000000e+00> : vector<1x128xf32>
    %1 = vector.multi_reduction <add>, %0, %cst [0] : vector<2x1x128xf32> to vector<1x128xf32>
    %c0_2 = arith.constant 0 : index
    %c0_3 = arith.constant 0 : index
    %c0_4 = arith.constant 0 : index
    %2 = vector.load %arg2[%c0_2, %c0_3, %c0_4] : memref<2x1x128xf32, #tpu.memory_space<vmem>>, vector<2x1x128xf32>
    %cst_5 = arith.constant dense<0.000000e+00> : vector<1x128xf32>
    %3 = vector.multi_reduction <add>, %2, %cst_5 [0] : vector<2x1x128xf32> to vector<1x128xf32>
    %cst_6 = arith.constant 7.812500e-03 : f32
    %4 = vector.broadcast %cst_6 : f32 to vector<1x128xf32>
    %5 = arith.mulf %1, %4 : vector<1x128xf32>
    %cst_7 = arith.constant 7.812500e-03 : f32
    %6 = vector.broadcast %cst_7 : f32 to vector<1x128xf32>
    %7 = arith.mulf %3, %6 : vector<1x128xf32>
    %8 = arith.mulf %5, %5 : vector<1x128xf32>
    %9 = arith.subf %7, %8 : vector<1x128xf32>
    %cst_8 = arith.constant 0.000000e+00 : f32
    %10 = vector.broadcast %cst_8 : f32 to vector<1x128xf32>
    %11 = arith.maximumf %9, %10 : vector<1x128xf32>
    %c0_9 = arith.constant 0 : index
    %c0_10 = arith.constant 0 : index
    %12 = vector.load %arg3[%c0_9, %c0_10] : memref<1x128xf32, #tpu.memory_space<vmem>>, vector<1x128xf32>
    %cst_11 = arith.constant 9.99999974E-6 : f32
    %13 = vector.broadcast %cst_11 : f32 to vector<1x128xf32>
    %14 = arith.addf %11, %13 : vector<1x128xf32>
    %15 = math.rsqrt %14 : vector<1x128xf32>
    %16 = arith.mulf %12, %15 : vector<1x128xf32>
    %c0_12 = arith.constant 0 : index
    %c0_13 = arith.constant 0 : index
    %17 = vector.load %arg4[%c0_12, %c0_13] : memref<1x128xf32, #tpu.memory_space<vmem>>, vector<1x128xf32>
    %18 = arith.mulf %5, %16 : vector<1x128xf32>
    %19 = arith.subf %17, %18 : vector<1x128xf32>
    %c0_14 = arith.constant 0 : index
    %c0_15 = arith.constant 0 : index
    %c0_16 = arith.constant 0 : index
    %20 = vector.load %arg5[%c0_14, %c0_15, %c0_16] : memref<2x32x128xf32, #tpu.memory_space<vmem>>, vector<2x32x128xf32>
    %21 = vector.shape_cast %16 : vector<1x128xf32> to vector<1x1x128xf32>
    %22 = vector.broadcast %21 : vector<1x1x128xf32> to vector<2x32x128xf32>
    %23 = arith.mulf %22, %20 : vector<2x32x128xf32>
    %24 = vector.shape_cast %19 : vector<1x128xf32> to vector<1x1x128xf32>
    %25 = vector.broadcast %24 : vector<1x1x128xf32> to vector<2x32x128xf32>
    %26 = arith.addf %23, %25 : vector<2x32x128xf32>
    %c0_17 = arith.constant 0 : index
    %c0_18 = arith.constant 0 : index
    %c0_19 = arith.constant 0 : index
    %27 = vector.load %arg6[%c0_17, %c0_18, %c0_19] : memref<2x32x128xf32, #tpu.memory_space<vmem>>, vector<2x32x128xf32>
    %28 = arith.addf %26, %27 : vector<2x32x128xf32>
    %cst_20 = arith.constant 0.000000e+00 : f32
    %29 = vector.broadcast %cst_20 : f32 to vector<2x32x128xf32>
    %30 = arith.maximumf %28, %29 : vector<2x32x128xf32>
    %c0_21 = arith.constant 0 : index
    %c0_22 = arith.constant 0 : index
    %c0_23 = arith.constant 0 : index
    %31 = vector.load %arg7[%c0_21, %c0_22, %c0_23] : memref<2x32x128xf32, #tpu.memory_space<vmem>>, vector<2x32x128xf32>
    tpu.vector_store %arg7[%c0_21, %c0_22, %c0_23], %30 {strides = array<i32>} : memref<2x32x128xf32, #tpu.memory_space<vmem>>, vector<2x32x128xf32>,
    return
  }
  func.func @transform_0(%arg0: i32) -> (i32, i32, i32) {
    %c0_i32 = arith.constant 0 : i32
    %c0_i32_0 = arith.constant 0 : i32
    %c0_i32_1 = arith.constant 0 : i32
    %c0_i32_2 = arith.constant 0 : i32
    return %c0_i32, %c0_i32_0, %c0_i32_1 : i32, i32, i32
  }
  func.func @transform_1(%arg0: i32) -> (i32, i32, i32) {
    %c0_i32 = arith.constant 0 : i32
    %c0_i32_0 = arith.constant 0 : i32
    %c0_i32_1 = arith.constant 0 : i32
    %c0_i32_2 = arith.constant 0 : i32
    return %c0_i32, %c0_i32_0, %c0_i32_1 : i32, i32, i32
  }
  func.func @transform_2(%arg0: i32) -> (i32, i32) {
    %c0_i32 = arith.constant 0 : i32
    %c0_i32_0 = arith.constant 0 : i32
    %c0_i32_1 = arith.constant 0 : i32
    return %c0_i32, %c0_i32_0 : i32, i32
  }
  func.func @transform_3(%arg0: i32) -> (i32, i32) {
    %c0_i32 = arith.constant 0 : i32
    %c0_i32_0 = arith.constant 0 : i32
    %c0_i32_1 = arith.constant 0 : i32
    return %c0_i32, %c0_i32_0 : i32, i32
  }
  func.func @transform_4(%arg0: i32) -> (i32, i32, i32) {
    %c0_i32 = arith.constant 0 : i32
    %c0_i32_0 = arith.constant 0 : i32
    %c0_i32_1 = arith.constant 0 : i32
    return %c0_i32, %arg0, %c0_i32_0 : i32, i32, i32
  }
  func.func @transform_5(%arg0: i32) -> (i32, i32, i32) {
    %c0_i32 = arith.constant 0 : i32
    %c0_i32_0 = arith.constant 0 : i32
    %c0_i32_1 = arith.constant 0 : i32
    return %c0_i32, %arg0, %c0_i32_0 : i32, i32, i32
  }
  func.func @transform_6(%arg0: i32) -> (i32, i32, i32) {
    %c0_i32 = arith.constant 0 : i32
    %c0_i32_0 = arith.constant 0 : i32
    %c0_i32_1 = arith.constant 0 : i32
    return %c0_i32, %arg0, %c0_i32_0 : i32, i32, i32
  }
}

</mosaic_0001>

<bundles_post_ra>
// kernel: resblock_forward_ncl.6
= control target key start
LH: loop header
LB: loop body
LE: loop exit
PB: predicated region body
PF: predicated region fallthrough
CT: control target
= control target key end

     0   :  { %s965_s27 = smov 0   ;;  %s967_s28 = smov 0   ;;  %s1097_s0 = inlined_call_operand.vmem [shape: f32[2,1,32], index: 0, kind: input, shape index: {}]   ;;  %s1098_s1 = inlined_call_operand.vmem [shape: f32[2,1,32], index: 1, kind: input, shape index: {}]   ;;  %s1099_s2 = inlined_call_operand.vmem [shape: f32[1,32], index: 2, kind: input, shape index: {}]   ;;  %s1100_s3 = inlined_call_operand.vmem [shape: f32[1,32], index: 3, kind: input, shape index: {}]   ;;  %s1101_s4 = inlined_call_operand.vmem [shape: f32[2,64,32], index: 4, kind: input, shape index: {}]   ;;  %s1102_s5 = inlined_call_operand.vmem [shape: f32[32,128], index: 5, kind: input, shape index: {}]   ;;  %s1103_s6 = inlined_call_operand.vmem [shape: f32[2,64,128], index: 6, kind: output, shape index: {0}]   ;;  %s1104_s7 = inlined_call_operand.vmem [shape: f32[2,1,128], index: 7, kind: output, shape index: {1}]   ;;  %s1105_s8 = inlined_call_operand.vmem [shape: f32[2,1,128], index: 8, kind: output, shape index: {2}]  }
   0x1   :  { %s969_s29 = smov 0  }
   0x2 LB: > { %s981_s30 = sadd.s32 4294967295, %s918_s29   ;;  %s984_s9 = sadd.s32 1, %s918_s29   ;;  %s918_s29 = sphi %s969_s29, %s1109_s29   ;;  %s914_s28 = sphi %s967_s28, %s1108_s28   ;;  %s910_s27 = sphi %s965_s27, %s1107_s27  }
   0x3   : > { %s107_s10 = ssub.s32 %s918_s29, %s984_s9  ;;  %s110_s11 = sadd.s32 1, %s914_s28 }
   0x4   : > { %p108_p0 = scmp.eq.s32.totalorder %s107_s10, 0  ;;  %p117_p1 = scmp.ne.s32.totalorder %s914_s28, %s910_s27 }
   0x5   : > { %p118_p2 = scmp.eq.s32.totalorder %s918_s29, 0  ;;  %p168_p3 = scmp.eq.s32.totalorder %s981_s30, 1 }
   0x6   : > { %s994_s12 = scalar_select %p108_p0, %s914_s28, %s110_s11  }
   0x7   : > { %p119_p4 = por %p118_p2, %p117_p1  ;;  %p996_p5 = por %p168_p3, %p117_p1 }
   0x8   : > { %p808_p6 = scmp.ge.s32.totalorder %s918_s29, 2 }
   0xa   : > { %257 = sbr.rel (%p808_p6) target bundleno = 23 (0x17), region = 36 }
   0xf   : > { %260 = sbr.rel (!%p119_p4) target bundleno = 23 (0x17), region = 40  ;;  %s262_s14 = sand.u32 (%p119_p4), 1, %s914_s28  }
  0x10   : > { %s828_s15 = sshll.u32 (%p119_p4), %s918_s29, 5  ;;  %s809_s16 = sshll.u32 (%p119_p4), %s262_s14, 6 }
  0x11   : > { %s267_s19 = scalar_lea.vmem (%p119_p4), %s1101_s4, %s828_s15  ;;  %s264_s20 = scalar_lea.vmem (%p119_p4), [#allocation2], %s809_s16 }
  0x12   : > { %v310_v0 = vld [vmem:[%s267_s19] sm:$0xff] (%p119_p4)  ;;  %v312_v1 = vld [vmem:[%s267_s19 + $0x8] sm:$0xff] (%p119_p4)  ;;  %v314_v2 = vld [vmem:[%s267_s19 + $0x10] sm:$0xff] (%p119_p4) }
  0x13   : > { %311 = vst [vmem:[%s264_s20] sm:$0xff] (%p119_p4), %v310_v0  ;;  %313 = vst [vmem:[%s264_s20 + $0x8] sm:$0xff] (%p119_p4), %v312_v1  ;;  %v316_v3 = vld [vmem:[%s267_s19 + $0x18] sm:$0xff] (%p119_p4)  ;;  %v318_v4 = vld [vmem:[%s267_s19 + $0x40] sm:$0xff] (%p119_p4) }
  0x14   : > { %315 = vst [vmem:[%s264_s20 + $0x10] sm:$0xff] %v314_v2  ;;  %v320_v5 = vld [vmem:[%s267_s19 + $0x48] sm:$0xff]  ;;  %317 = vst [vmem:[%s264_s20 + $0x18] sm:$0xff] %v316_v3  ;;  %v322_v6 = vld [vmem:[%s267_s19 + $0x50] sm:$0xff] }
  0x15   : > { %319 = vst [vmem:[%s264_s20 + $0x20] sm:$0xff] %v318_v4  ;;  %321 = vst [vmem:[%s264_s20 + $0x28] sm:$0xff] %v320_v5  ;;  %v324_v7 = vld [vmem:[%s267_s19 + $0x58] sm:$0xff] }
  0x16   : > { %323 = vst [vmem:[%s264_s20 + $0x30] sm:$0xff] %v322_v6  ;;  %325 = vst [vmem:[%s264_s20 + $0x38] sm:$0xff] %v324_v7 }
  0x17 PF: > { %p812_p7 = scmp.ge.s32.totalorder %s918_s29, 1  ;;  %p330_p8 = scmp.lt.s32.totalorder %s918_s29, 3 }
  0x19   : > { %p331_p9 = pnand %p812_p7, %p330_p8 }
  0x1a   : > { %s337_s21 = sand.u32 (!%p331_p9), 1, %s910_s27   ;;  %p377_p10 = scmp.lt.s32.totalorder (!%p331_p9), %s981_s30, 1 }
  0x1b   : > { %334 = sbr.rel (%p331_p9) target bundleno = 300 (0x12c), region = 78  ;;  %s1037_s22 = sshll.u32 (!%p331_p9), %s337_s21, 6 }
  0x1c   : > { %s339_s10 = scalar_lea.vmem (!%p331_p9), [#allocation2], %s1037_s22  ;;  %s1055_s27 = scalar_lea.vmem (!%p331_p9), [#allocation3], %s1037_s22 }
  0x20   : > { %v453_v8 = vld [vmem:[%s1102_s5 + $0x18] sm:$0xff]  ;;  %v452_v9 = vld [vmem:[%s1102_s5 + $0x10] sm:$0xff]  ;;  %vm385_vm0 = vcmask 253952   ;;  %v383_v10 = vld [vmem:[%s1097_s0] sm:$0x1]  ;;  %v415_v28 = vlaneseq  ;;  %vm454_vm1 = vcmask 261120  }
  0x21   : > { %842 = vmatprep.subr.mxu0 %v453_v8  ;;  %862 = vmatprep.subr.mxu1 %v453_v8  ;;  %v384_v11 = vld [vmem:[%s1097_s0 + $0x1] sm:$0x1]  ;;  %v451_v12 = vld [vmem:[%s1102_s5 + $0x8] sm:$0xff]  ;;  %v386_v13 = vsel %vm385_vm0, %v383_v10, 0.0  ;;  %v389_v15 = vld [vmem:[%s1098_s1] sm:$0x1] }
  0x22   : > { %843 = vmatpush3.msra.mxu0 %v453_v8  ;;  %866 = vmatpush3.msra.mxu1 %v453_v8  ;;  %v387_v14 = vsel %vm385_vm0, %v384_v11, 0.0  ;;  %v390_v17 = vld [vmem:[%s1098_s1 + $0x1] sm:$0x1]  ;;  %v391_v18 = vsel %vm385_vm0, %v389_v15, 0.0  ;;  %v416_v29 = vshrl.u32 %v415_v28, 7  ;;  %v407_v36 = vld [vmem:[%s339_s10 + $0x8] sm:$0xff] }
  0x23   : > { %844 = vmatprep.subr.mxu0 %v452_v9  ;;  %v388_v16 = vadd.f32 %v387_v14, %v386_v13  ;;  %863 = vmatprep.subr.mxu1 %v452_v9  ;;  %v450_v19 = vld [vmem:[%s1102_s5] sm:$0xff]  ;;  %v392_v20 = vsel %vm385_vm0, %v390_v17, 0.0  ;;  %v408_v37 = vld [vmem:[%s339_s10 + $0x10] sm:$0xff]  ;;  %v409_v38 = vld [vmem:[%s339_s10 + $0x18] sm:$0xff]  ;;  %s378_s11 = scalar_select %p377_p10, %s981_s30, 1 }
  0x24   : > { %845 = vmatpush3.msra.mxu0 %v452_v9  ;;  %867 = vmatpush3.msra.mxu1 %v452_v9  ;;  %v393_v21 = vadd.f32 %v392_v20, %v391_v18  ;;  %v399_v30 = vld [vmem:[%s1099_s2] sm:$0x1]  ;;  %v417_v31 = vsub.s32 0, %v416_v29  ;;  %v411_v42 = vld [vmem:[%s339_s10 + $0x28] sm:$0xff]  ;;  %v412_v43 = vld [vmem:[%s339_s10 + $0x30] sm:$0xff]  ;;  %s829_s19 = sshll.u32 (%p996_p5), %s981_s30, 5 }
  0x25   : > { %846 = vmatprep.subr.mxu0 %v451_v12  ;;  %v394_v22 = vmul.f32 0.0078125, %v388_v16  ;;  %864 = vmatprep.subr.mxu1 %v451_v12  ;;  %v403_v34 = vld [vmem:[%s1100_s3] sm:$0x1]  ;;  %v413_v44 = vld [vmem:[%s339_s10 + $0x38] sm:$0xff]  ;;  %s379_s15 = scalar_lea.vmem %s1104_s7, %s378_s11  ;;  %s382_s18 = scalar_lea.vmem %s1105_s8, %s378_s11 }
  0x26   : > { %847 = vmatpush3.msra.mxu0 %v451_v12  ;;  %868 = vmatpush3.msra.mxu1 %v451_v12  ;;  %v395_v23 = vmul.f32 0.0078125, %v393_v21  ;;  %v406_v35 = vld [vmem:[%s339_s10] sm:$0xff]  ;;  %s643_s22 = scalar_lea.vmem (%p996_p5), %s1103_s6, %s829_s19 }
  0x27   : > { %848 = vmatprep.subr.mxu0 %v450_v19  ;;  %v396_v24 = vmul.f32 %v394_v22, %v394_v22  ;;  %865 = vmatprep.subr.mxu1 %v450_v19  ;;  %v410_v41 = vld [vmem:[%s339_s10 + $0x20] sm:$0xff] }
  0x28   : > { %849 = vmatpush3.msra.mxu0 %v450_v19  ;;  %869 = vmatpush3.msra.mxu1 %v450_v19 }
  0x29   : > { %v397_v25 = vsub.f32 %v395_v23, %v396_v24 }
  0x2b   : > { %v398_v26 = vmax.f32 %v397_v25, 0.0 }
  0x2d   : > { %v400_v27 = vadd.f32 1e-05, %v398_v26 }
  0x2f   : > { %894 = vrsqrt.f32 %v400_v27 }
  0x3c   : > { %v895_v32 = vpop.eup %894 }
  0x3d   : > { %v402_v33 = vmul.f32 %v895_v32, %v399_v30 }
  0x3f   : > { %v404_v39 = vmul.f32 %v402_v33, %v394_v22  ;;  %v418_v40 = vrot.slane %v402_v33, %v417_v31 }
  0x41   : > { %v405_v45 = vsub.f32 %v403_v34, %v404_v39  ;;  %v420_v46 = vmul.f32 %v418_v40, %v406_v35  ;;  %v421_v47 = vmul.f32 %v418_v40, %v407_v36  ;;  %v422_v48 = vmul.f32 %v418_v40, %v408_v37 }
  0x42   : > { %v423_v49 = vmul.f32 %v418_v40, %v409_v38  ;;  %v424_v50 = vmul.f32 %v418_v40, %v410_v41  ;;  %v425_v51 = vmul.f32 %v418_v40, %v411_v42  ;;  %v426_v52 = vmul.f32 %v418_v40, %v412_v43 }
  0x43   : > { %v432_v53 = vrot.slane %v405_v45, %v417_v31  ;;  %v427_v54 = vmul.f32 %v418_v40, %v413_v44 }
  0x45   : > { %v434_v55 = vadd.f32 %v432_v53, %v420_v46  ;;  %v435_v56 = vadd.f32 %v432_v53, %v421_v47  ;;  %v436_v57 = vadd.f32 %v432_v53, %v422_v48  ;;  %v437_v58 = vadd.f32 %v432_v53, %v423_v49 }
  0x46   : > { %v438_v59 = vadd.f32 %v432_v53, %v424_v50  ;;  %v439_v60 = vadd.f32 %v432_v53, %v425_v51  ;;  %v440_v61 = vadd.f32 %v432_v53, %v426_v52  ;;  %v441_v1 = vadd.f32 %v432_v53, %v427_v54 }
  0x47   : > { %v442_v62 = vmax.f32 %v434_v55, 0.0  ;;  %v443_v63 = vmax.f32 %v435_v56, 0.0  ;;  %v444_v0 = vmax.f32 %v436_v57, 0.0  ;;  %v445_v5 = vmax.f32 %v437_v58, 0.0 }
  0x48   : > { %v446_v2 = vmax.f32 %v438_v59, 0.0  ;;  %v447_v3 = vmax.f32 %v439_v60, 0.0  ;;  %v448_v4 = vmax.f32 %v440_v61, 0.0  ;;  %v449_v6 = vmax.f32 %v441_v1, 0.0 }
  0x49   : > { %850 = vmatprep.mubr.msk.f32.mxu0 %vm454_vm1, %v442_v62 }
  0x4a   : > { %851 = vmatmul.mubr.msk.f32.vlgmr.msra.gmra.mxu0 %vm454_vm1, %v443_v63  ;;  %856 = vmatprep.mubr.msk.f32.mxu1 %vm454_vm1, %v446_v2 }
  0x4b   : > { %853 = vmatprep.mubr.msk.f32.mxu0 %vm454_vm1, %v444_v0  ;;  %857 = vmatmul.mubr.msk.f32.vlgmr.msra.gmra.mxu1 %vm454_vm1, %v447_v3 }
  0x4c   : > { %859 = vmatprep.mubr.msk.f32.mxu1 %vm454_vm1, %v448_v4 }
  0x4e   : > { %854 = vmatmul.mubr.msk.f32.gmra.mxu0 %vm454_vm1, %v445_v5 }
  0x4f   : > { %860 = vmatmul.mubr.msk.f32.gmra.mxu1 %vm454_vm1, %v449_v6 }
 0x10a   : > { %v852_v7 = vpop.f32.mrf.mxu0 }
 0x10b   : > { %585 = vst [vmem:[%s1055_s27 + $0x8] sm:$0xff] %v852_v7  ;;  %v858_v8 = vpop.f32.mrf.mxu1  ;;  %v607_v13 = vmul.f32 %v852_v7, %v852_v7 }
 0x10c   : > { %v545_v9 = vpop.f32.mrf.mxu0  ;;  %589 = vst [vmem:[%s1055_s27 + $0x28] sm:$0xff] %v858_v8  ;;  %v611_v27 = vmul.f32 %v858_v8, %v858_v8 }
 0x10d   : > { %584 = vst [vmem:[%s1055_s27] sm:$0xff] %v545_v9  ;;  %v606_v10 = vmul.f32 %v545_v9, %v545_v9  ;;  %v565_v11 = vpop.f32.mrf.mxu1  ;;  %v592_v14 = vadd.f32 %v852_v7, %v545_v9 }
 0x10e   : > { %v855_v12 = vpop.f32.mrf.mxu0  ;;  %588 = vst [vmem:[%s1055_s27 + $0x20] sm:$0xff] %v565_v11  ;;  %v610_v26 = vmul.f32 %v565_v11, %v565_v11 }
 0x10f   : > { %587 = vst [vmem:[%s1055_s27 + $0x18] sm:$0xff] %v855_v12  ;;  %v861_v15 = vpop.f32.mrf.mxu1  ;;  %v614_v17 = vadd.f32 %v607_v13, %v606_v10  ;;  %v609_v21 = vmul.f32 %v855_v12, %v855_v12 }
 0x110   : > { %v555_v16 = vpop.f32.mrf.mxu0  ;;  %591 = vst [vmem:[%s1055_s27 + $0x38] sm:$0xff] %v861_v15  ;;  %v613_v33 = vmul.f32 %v861_v15, %v861_v15 }
 0x111   : > { %586 = vst [vmem:[%s1055_s27 + $0x10] sm:$0xff] %v555_v16  ;;  %v593_v18 = vadd.f32 %v592_v14, %v555_v16  ;;  %v608_v19 = vmul.f32 %v555_v16, %v555_v16  ;;  %v575_v20 = vpop.f32.mrf.mxu1 }
 0x112   : > { %590 = vst [vmem:[%s1055_s27 + $0x30] sm:$0xff] %v575_v20  ;;  %v612_v31 = vmul.f32 %v575_v20, %v575_v20  ;;  %v688_v50 = vld [vmem:[%s1055_s27 + $0x8] sm:$0xff] (%p996_p5) }
 0x113   : > { %v594_v22 = vadd.f32 %v855_v12, %v593_v18  ;;  %v615_v23 = vadd.f32 %v614_v17, %v608_v19  ;;  %v696_v54 = vld [vmem:[%s1055_s27 + $0x28] sm:$0xff] (%p996_p5)  ;;  %689 = vst [vmem:[%s643_s22 + $0x8] sm:$0xff] (%p996_p5), %v688_v50 }
 0x114   : > { %v686_v49 = vld [vmem:[%s1055_s27] sm:$0xff] (%p996_p5)  ;;  %697 = vst [vmem:[%s643_s22 + $0x48] sm:$0xff] (%p996_p5), %v696_v54 }
 0x115   : > { %v616_v24 = vadd.f32 %v615_v23, %v609_v21  ;;  %v595_v25 = vadd.f32 %v594_v22, %v565_v11  ;;  %v694_v53 = vld [vmem:[%s1055_s27 + $0x20] sm:$0xff] (%p996_p5)  ;;  %687 = vst [vmem:[%s643_s22] sm:$0xff] (%p996_p5), %v686_v49 }
 0x116   : > { %v692_v52 = vld [vmem:[%s1055_s27 + $0x18] sm:$0xff] (%p996_p5)  ;;  %695 = vst [vmem:[%s643_s22 + $0x40] sm:$0xff] (%p996_p5), %v694_v53 }
 0x117   : > { %v617_v28 = vadd.f32 %v616_v24, %v610_v26  ;;  %v596_v29 = vadd.f32 %v858_v8, %v595_v25  ;;  %693 = vst [vmem:[%s643_s22 + $0x18] sm:$0xff] (%p996_p5), %v692_v52  ;;  %v700_v56 = vld [vmem:[%s1055_s27 + $0x38] sm:$0xff] (%p996_p5) }
 0x118   : > { %v690_v51 = vld [vmem:[%s1055_s27 + $0x10] sm:$0xff] (%p996_p5)  ;;  %701 = vst [vmem:[%s643_s22 + $0x58] sm:$0xff] (%p996_p5), %v700_v56 }
 0x119   : > { %v597_v30 = vadd.f32 %v596_v29, %v575_v20  ;;  %v618_v32 = vadd.f32 %v617_v28, %v611_v27  ;;  %691 = vst [vmem:[%s643_s22 + $0x10] sm:$0xff] (%p996_p5), %v690_v51  ;;  %v698_v55 = vld [vmem:[%s1055_s27 + $0x30] sm:$0xff] (%p996_p5) }
 0x11a   : > { %699 = vst [vmem:[%s643_s22 + $0x50] sm:$0xff] (%p996_p5), %v698_v55 }
 0x11b   : > { %v598_v34 = vadd.f32 %v861_v15, %v597_v30  ;;  %v619_v35 = vadd.f32 %v618_v32, %v612_v31 }
 0x11d   : > { %v599_v36 = vrot.slane %v598_v34, 4  ;;  %v620_v37 = vadd.f32 %v619_v35, %v613_v33 }
 0x11f   : > { %v600_v38 = vadd.f32 %v599_v36, %v598_v34  ;;  %v621_v39 = vrot.slane %v620_v37, 4 }
 0x121   : > { %v601_v40 = vrot.slane %v600_v38, 2  ;;  %v622_v41 = vadd.f32 %v621_v39, %v620_v37 }
 0x123   : > { %v602_v42 = vadd.f32 %v601_v40, %v600_v38  ;;  %v623_v43 = vrot.slane %v622_v41, 2 }
 0x125   : > { %v603_v44 = vrot.slane %v602_v42, 1  ;;  %v624_v45 = vadd.f32 %v623_v43, %v622_v41 }
 0x127   : > { %v604_v46 = vadd.f32 %v603_v44, %v602_v42  ;;  %v625_v47 = vrot.slane %v624_v45, 1  ;;  %640 = sbr.rel (!%p996_p5) target bundleno = 300 (0x12c), region = 86 }
 0x129   : > { %605 = vst [vmem:[%s379_s15] sm:$0x1] %v604_v46  ;;  %v626_v48 = vadd.f32 %v625_v47, %v624_v45 }
 0x12b   : > { %627 = vst [vmem:[%s382_s18] sm:$0x1] %v626_v48 }
 0x12c PF: > { %p16_p11 = scmp.ge.s32.totalorder %s984_s9, 4   ;;  %s1107_s27 = smov %s914_s28 }
 0x12d   : > { %s1108_s28 = smov %s994_s12  ;;  %s1109_s29 = smov %s984_s9 }
 0x12e   :  { %18 = sbr.rel (!%p16_p11) target bundleno = 2 (0x2), region = 179 }

// kernel: resblock_forward_ncl.4
= control target key start
LH: loop header
LB: loop body
LE: loop exit
PB: predicated region body
PF: predicated region fallthrough
CT: control target
= control target key end

     0   :  { %s833_s15 = smov 0   ;;  %s835_s16 = smov 0   ;;  %s1005_s0 = inlined_call_operand.vmem [shape: f32[2,64,128], index: 0, kind: input, shape index: {}]   ;;  %s1006_s1 = inlined_call_operand.vmem [shape: f32[128,32], index: 1, kind: input, shape index: {}]   ;;  %s1007_s2 = inlined_call_operand.vmem [shape: f32[2,64,32], index: 2, kind: output, shape index: {0}]   ;;  %s1008_s3 = inlined_call_operand.vmem [shape: f32[2,1,32], index: 3, kind: output, shape index: {1}]   ;;  %s1009_s4 = inlined_call_operand.vmem [shape: f32[2,1,32], index: 4, kind: output, shape index: {2}]  }
   0x1   :  { %s837_s17 = smov 0  }
   0x2 LB: > { %s849_s18 = sadd.s32 4294967295, %s806_s17   ;;  %s852_s19 = sadd.s32 1, %s806_s17   ;;  %s806_s17 = sphi %s837_s17, %s1013_s17   ;;  %s802_s16 = sphi %s835_s16, %s1012_s16   ;;  %s798_s15 = sphi %s833_s15, %s1011_s15  }
   0x3   : > { %s19_s20 = ssub.s32 %s806_s17, %s852_s19  ;;  %s22_s21 = sadd.s32 1, %s802_s16 }
   0x4   : > { %p20_p0 = scmp.eq.s32.totalorder %s19_s20, 0  ;;  %p29_p1 = scmp.ne.s32.totalorder %s802_s16, %s798_s15 }
   0x5   : > { %p30_p2 = scmp.eq.s32.totalorder %s806_s17, 0  ;;  %p80_p3 = scmp.eq.s32.totalorder %s849_s18, 1 }
   0x6   : > { %s862_s22 = scalar_select %p20_p0, %s802_s16, %s22_s21  }
   0x7   : > { %p31_p4 = por %p30_p2, %p29_p1  ;;  %p864_p5 = por %p80_p3, %p29_p1 }
   0x8   : > { %p646_p6 = scmp.ge.s32.totalorder %s806_s17, 2 }
   0xa   : > { %157 = sbr.rel (%p646_p6) target bundleno = 23 (0x17), region = 20 }
   0xf   : > { %160 = sbr.rel (!%p31_p4) target bundleno = 23 (0x17), region = 24  ;;  %s162_s24 = sand.u32 (%p31_p4), 1, %s802_s16  }
  0x10   : > { %s658_s25 = sshll.u32 (%p31_p4), %s806_s17, 5  ;;  %s647_s26 = sshll.u32 (%p31_p4), %s162_s24, 6 }
  0x11   : > { %s167_s29 = scalar_lea.vmem (%p31_p4), %s1005_s0, %s658_s25  ;;  %s164_s30 = scalar_lea.vmem (%p31_p4), [#allocation2], %s647_s26 }
  0x12   : > { %v210_v0 = vld [vmem:[%s167_s29] sm:$0xff] (%p31_p4)  ;;  %v212_v1 = vld [vmem:[%s167_s29 + $0x8] sm:$0xff] (%p31_p4)  ;;  %v214_v2 = vld [vmem:[%s167_s29 + $0x10] sm:$0xff] (%p31_p4) }
  0x13   : > { %211 = vst [vmem:[%s164_s30] sm:$0xff] (%p31_p4), %v210_v0  ;;  %213 = vst [vmem:[%s164_s30 + $0x8] sm:$0xff] (%p31_p4), %v212_v1  ;;  %v216_v3 = vld [vmem:[%s167_s29 + $0x18] sm:$0xff] (%p31_p4)  ;;  %v218_v4 = vld [vmem:[%s167_s29 + $0x40] sm:$0xff] (%p31_p4) }
  0x14   : > { %215 = vst [vmem:[%s164_s30 + $0x10] sm:$0xff] %v214_v2  ;;  %v220_v5 = vld [vmem:[%s167_s29 + $0x48] sm:$0xff]  ;;  %217 = vst [vmem:[%s164_s30 + $0x18] sm:$0xff] %v216_v3  ;;  %v222_v6 = vld [vmem:[%s167_s29 + $0x50] sm:$0xff] }
  0x15   : > { %219 = vst [vmem:[%s164_s30 + $0x20] sm:$0xff] %v218_v4  ;;  %221 = vst [vmem:[%s164_s30 + $0x28] sm:$0xff] %v220_v5  ;;  %v224_v7 = vld [vmem:[%s167_s29 + $0x58] sm:$0xff] }
  0x16   : > { %223 = vst [vmem:[%s164_s30 + $0x30] sm:$0xff] %v222_v6  ;;  %225 = vst [vmem:[%s164_s30 + $0x38] sm:$0xff] %v224_v7 }
  0x17 PF: > { %p650_p7 = scmp.ge.s32.totalorder %s806_s17, 1  ;;  %p230_p8 = scmp.lt.s32.totalorder %s806_s17, 3 }
  0x19   : > { %p231_p9 = pnand %p650_p7, %p230_p8 }
  0x1a   : > { %s237_s29 = sand.u32 (!%p231_p9), 1, %s798_s15   ;;  %p269_p10 = scmp.lt.s32.totalorder (!%p231_p9), %s849_s18, 1 }
  0x1b   : > { %234 = sbr.rel (%p231_p9) target bundleno = 292 (0x124), region = 62  ;;  %s910_s8 = sshll.u32 (!%p231_p9), %s237_s29, 6 }
  0x1c   : > { %s922_s14 = scalar_lea.vmem (!%p231_p9), [#allocation2], %s910_s8  ;;  %s939_s25 = scalar_lea.vmem (!%p231_p9), [#allocation3], %s910_s8 }
  0x20   : > { %v298_v8 = vld [vmem:[%s1006_s1 + $0x78] sm:$0xff]  ;;  %v297_v9 = vld [vmem:[%s1006_s1 + $0x70] sm:$0xff]  ;;  %v296_v10 = vld [vmem:[%s1006_s1 + $0x68] sm:$0xff]  ;;  %vm404_vm0 = vcmask 261120   ;;  %s270_s26 = scalar_select %p269_p10, %s849_s18, 1  ;;  %vm434_vm1 = vcmask 253952  }
  0x21   : > { %684 = vmatprep.subr.mxu0 %v298_v8  ;;  %728 = vmatprep.subr.mxu1 %v298_v8  ;;  %v295_v11 = vld [vmem:[%s1006_s1 + $0x60] sm:$0xff]  ;;  %v294_v12 = vld [vmem:[%s1006_s1 + $0x58] sm:$0xff]  ;;  %v293_v13 = vld [vmem:[%s1006_s1 + $0x50] sm:$0xff]  ;;  %s659_s7 = sshll.u32 (%p864_p5), %s849_s18, 5 }
  0x22   : > { %685 = vmatpush3.msra.mxu0 %v298_v8  ;;  %744 = vmatpush3.msra.mxu1 %v298_v8  ;;  %v292_v14 = vld [vmem:[%s1006_s1 + $0x48] sm:$0xff]  ;;  %v291_v15 = vld [vmem:[%s1006_s1 + $0x40] sm:$0xff]  ;;  %v290_v16 = vld [vmem:[%s1006_s1 + $0x38] sm:$0xff]  ;;  %s271_s29 = scalar_lea.vmem %s1008_s3, %s270_s26  ;;  %s274_s6 = scalar_lea.vmem %s1009_s4, %s270_s26 }
  0x23   : > { %686 = vmatprep.subr.mxu0 %v297_v9  ;;  %729 = vmatprep.subr.mxu1 %v297_v9  ;;  %v289_v17 = vld [vmem:[%s1006_s1 + $0x30] sm:$0xff]  ;;  %v288_v18 = vld [vmem:[%s1006_s1 + $0x28] sm:$0xff]  ;;  %v287_v19 = vld [vmem:[%s1006_s1 + $0x20] sm:$0xff]  ;;  %s481_s9 = scalar_lea.vmem (%p864_p5), %s1007_s2, %s659_s7 }
  0x24   : > { %687 = vmatpush3.msra.mxu0 %v297_v9  ;;  %745 = vmatpush3.msra.mxu1 %v297_v9  ;;  %v286_v20 = vld [vmem:[%s1006_s1 + $0x18] sm:$0xff]  ;;  %v285_v21 = vld [vmem:[%s1006_s1 + $0x10] sm:$0xff]  ;;  %v275_v22 = vld [vmem:[%s922_s14] sm:$0xff] }
  0x25   : > { %688 = vmatprep.subr.mxu0 %v296_v10  ;;  %730 = vmatprep.subr.mxu1 %v296_v10  ;;  %v284_v23 = vld [vmem:[%s1006_s1 + $0x8] sm:$0xff]  ;;  %v283_v24 = vld [vmem:[%s1006_s1] sm:$0xff]  ;;  %v277_v26 = vld [vmem:[%s922_s14 + $0x10] sm:$0xff] }
  0x26   : > { %689 = vmatpush3.msra.mxu0 %v296_v10  ;;  %746 = vmatpush3.msra.mxu1 %v296_v10  ;;  %v276_v25 = vld [vmem:[%s922_s14 + $0x8] sm:$0xff]  ;;  %v279_v27 = vld [vmem:[%s922_s14 + $0x20] sm:$0xff]  ;;  %v281_v29 = vld [vmem:[%s922_s14 + $0x30] sm:$0xff] }
  0x27   : > { %690 = vmatprep.subr.mxu0 %v295_v11  ;;  %731 = vmatprep.subr.mxu1 %v295_v11  ;;  %v280_v28 = vld [vmem:[%s922_s14 + $0x28] sm:$0xff]  ;;  %v278_v30 = vld [vmem:[%s922_s14 + $0x18] sm:$0xff] }
  0x28   : > { %691 = vmatpush3.msra.mxu0 %v295_v11  ;;  %747 = vmatpush3.msra.mxu1 %v295_v11  ;;  %v282_v31 = vld [vmem:[%s922_s14 + $0x38] sm:$0xff] }
  0x29   : > { %692 = vmatprep.subr.mxu0 %v294_v12  ;;  %732 = vmatprep.subr.mxu1 %v294_v12 }
  0x2a   : > { %693 = vmatpush3.msra.mxu0 %v294_v12  ;;  %748 = vmatpush3.msra.mxu1 %v294_v12 }
  0x2b   : > { %694 = vmatprep.subr.mxu0 %v293_v13  ;;  %733 = vmatprep.subr.mxu1 %v293_v13 }
  0x2c   : > { %695 = vmatpush3.msra.mxu0 %v293_v13  ;;  %749 = vmatpush3.msra.mxu1 %v293_v13 }
  0x2d   : > { %696 = vmatprep.subr.mxu0 %v292_v14  ;;  %734 = vmatprep.subr.mxu1 %v292_v14 }
  0x2e   : > { %697 = vmatpush3.msra.mxu0 %v292_v14  ;;  %750 = vmatpush3.msra.mxu1 %v292_v14 }
  0x2f   : > { %698 = vmatprep.subr.mxu0 %v291_v15  ;;  %735 = vmatprep.subr.mxu1 %v291_v15 }
  0x30   : > { %699 = vmatpush3.msra.mxu0 %v291_v15  ;;  %751 = vmatpush3.msra.mxu1 %v291_v15 }
  0x31   : > { %700 = vmatprep.subr.mxu0 %v290_v16  ;;  %736 = vmatprep.subr.mxu1 %v290_v16 }
  0x32   : > { %701 = vmatpush3.msra.mxu0 %v290_v16  ;;  %752 = vmatpush3.msra.mxu1 %v290_v16 }
  0x33   : > { %702 = vmatprep.subr.mxu0 %v289_v17  ;;  %737 = vmatprep.subr.mxu1 %v289_v17 }
  0x34   : > { %703 = vmatpush3.msra.mxu0 %v289_v17  ;;  %753 = vmatpush3.msra.mxu1 %v289_v17 }
  0x35   : > { %704 = vmatprep.subr.mxu0 %v288_v18  ;;  %738 = vmatprep.subr.mxu1 %v288_v18 }
  0x36   : > { %705 = vmatpush3.msra.mxu0 %v288_v18  ;;  %754 = vmatpush3.msra.mxu1 %v288_v18 }
  0x37   : > { %706 = vmatprep.subr.mxu0 %v287_v19  ;;  %739 = vmatprep.subr.mxu1 %v287_v19 }
  0x38   : > { %707 = vmatpush3.msra.mxu0 %v287_v19  ;;  %755 = vmatpush3.msra.mxu1 %v287_v19 }
  0x39   : > { %708 = vmatprep.subr.mxu0 %v286_v20  ;;  %740 = vmatprep.subr.mxu1 %v286_v20 }
  0x3a   : > { %709 = vmatpush3.msra.mxu0 %v286_v20  ;;  %756 = vmatpush3.msra.mxu1 %v286_v20 }
  0x3b   : > { %710 = vmatprep.subr.mxu0 %v285_v21  ;;  %716 = vmatprep.mubr.f32.mxu0 %v275_v22 }
  0x3c   : > { %711 = vmatpush3.msra.mxu0 %v285_v21  ;;  %741 = vmatprep.subr.mxu1 %v285_v21 }
  0x3d   : > { %712 = vmatprep.subr.mxu0 %v284_v23  ;;  %757 = vmatpush3.msra.mxu1 %v285_v21 }
  0x3e   : > { %713 = vmatpush3.msra.mxu0 %v284_v23  ;;  %742 = vmatprep.subr.mxu1 %v284_v23 }
  0x3f   : > { %714 = vmatprep.subr.mxu0 %v283_v24  ;;  %758 = vmatpush3.msra.mxu1 %v284_v23 }
  0x40   : > { %715 = vmatpush3.msra.mxu0 %v283_v24  ;;  %743 = vmatprep.subr.mxu1 %v283_v24 }
  0x41   : > { %717 = vmatmul.mubr.f32.vlgmr.msra.gmra.mxu0 %v276_v25  ;;  %759 = vmatpush3.msra.mxu1 %v283_v24 }
  0x42   : > { %719 = vmatprep.mubr.f32.mxu0 %v277_v26  ;;  %722 = vmatprep.mubr.f32.mxu1 %v279_v27 }
  0x43   : > { %723 = vmatmul.mubr.f32.vlgmr.msra.gmra.mxu1 %v280_v28 }
  0x44   : > { %725 = vmatprep.mubr.f32.mxu1 %v281_v29 }
  0x45   : > { %720 = vmatmul.mubr.f32.gmra.mxu0 %v278_v30 }
  0x47   : > { %726 = vmatmul.mubr.f32.gmra.mxu1 %v282_v31 }
 0x101   : > { %v718_v32 = vpop.f32.mrf.mxu0 }
 0x102   : > { %406 = vst.msk [vmem:[%s939_s25 + $0x8] sm:$0xff] %vm404_vm0, %v718_v32  ;;  %v437_v35 = vmul.f32 %v718_v32, %v718_v32  ;;  %v414_v40 = vsel %vm404_vm0, %v718_v32, 0.0 }
 0x103   : > { %v365_v33 = vpop.f32.mrf.mxu0  ;;  %v724_v34 = vpop.f32.mrf.mxu1 }
 0x104   : > { %405 = vst.msk [vmem:[%s939_s25] sm:$0xff] %vm404_vm0, %v365_v33  ;;  %v413_v36 = vsel %vm404_vm0, %v365_v33, 0.0  ;;  %v436_v37 = vmul.f32 %v365_v33, %v365_v33  ;;  %410 = vst.msk [vmem:[%s939_s25 + $0x28] sm:$0xff] %vm404_vm0, %v724_v34  ;;  %v445_v45 = vsel %vm404_vm0, %v437_v35, 0.0  ;;  %v441_v58 = vmul.f32 %v724_v34, %v724_v34 }
 0x105   : > { %v721_v38 = vpop.f32.mrf.mxu0  ;;  %v385_v39 = vpop.f32.mrf.mxu1  ;;  %v415_v42 = vadd.f32 %v414_v40, %v413_v36  ;;  %v422_v62 = vsel %vm404_vm0, %v724_v34, 0.0 }
 0x106   : > { %v444_v41 = vsel %vm404_vm0, %v436_v37, 0.0  ;;  %408 = vst.msk [vmem:[%s939_s25 + $0x18] sm:$0xff] %vm404_vm0, %v721_v38  ;;  %409 = vst.msk [vmem:[%s939_s25 + $0x20] sm:$0xff] %vm404_vm0, %v385_v39  ;;  %v439_v46 = vmul.f32 %v721_v38, %v721_v38  ;;  %v418_v52 = vsel %vm404_vm0, %v721_v38, 0.0  ;;  %v440_v54 = vmul.f32 %v385_v39, %v385_v39 }
 0x107   : > { %v375_v43 = vpop.f32.mrf.mxu0  ;;  %v727_v44 = vpop.f32.mrf.mxu1  ;;  %v446_v49 = vadd.f32 %v445_v45, %v444_v41  ;;  %v420_v59 = vsel %vm404_vm0, %v385_v39, 0.0  ;;  %v453_v3 = vsel %vm404_vm0, %v441_v58, 0.0 }
 0x108   : > { %407 = vst.msk [vmem:[%s939_s25 + $0x10] sm:$0xff] %vm404_vm0, %v375_v43  ;;  %v416_v47 = vsel %vm404_vm0, %v375_v43, 0.0  ;;  %v438_v48 = vmul.f32 %v375_v43, %v375_v43  ;;  %412 = vst.msk [vmem:[%s939_s25 + $0x38] sm:$0xff] %vm404_vm0, %v727_v44  ;;  %v449_v57 = vsel %vm404_vm0, %v439_v46, 0.0  ;;  %v451_v63 = vsel %vm404_vm0, %v440_v54, 0.0 }
 0x109   : > { %v417_v50 = vadd.f32 %v416_v47, %v415_v42  ;;  %v395_v51 = vpop.f32.mrf.mxu1  ;;  %v443_v4 = vmul.f32 %v727_v44, %v727_v44  ;;  %v426_v8 = vsel %vm404_vm0, %v727_v44, 0.0  ;;  %v526_v27 = vld [vmem:[%s939_s25 + $0x8] sm:$0xff] (%p864_p5) }
 0x10a   : > { %v447_v53 = vsel %vm404_vm0, %v438_v48, 0.0  ;;  %411 = vst.msk [vmem:[%s939_s25 + $0x30] sm:$0xff] %vm404_vm0, %v395_v51  ;;  %v442_v0 = vmul.f32 %v395_v51, %v395_v51  ;;  %v424_v5 = vsel %vm404_vm0, %v395_v51, 0.0  ;;  %527 = vst [vmem:[%s481_s9 + $0x8] sm:$0xff] (%p864_p5), %v526_v27 }
 0x10b   : > { %v419_v55 = vadd.f32 %v418_v52, %v417_v50  ;;  %v448_v56 = vadd.f32 %v447_v53, %v446_v49  ;;  %v457_v12 = vsel %vm404_vm0, %v443_v4, 0.0  ;;  %v524_v26 = vld [vmem:[%s939_s25] sm:$0xff] (%p864_p5)  ;;  %v534_v31 = vld [vmem:[%s939_s25 + $0x28] sm:$0xff] (%p864_p5) }
 0x10c   : > { %v455_v9 = vsel %vm404_vm0, %v442_v0, 0.0  ;;  %525 = vst [vmem:[%s481_s9] sm:$0xff] (%p864_p5), %v524_v26  ;;  %535 = vst [vmem:[%s481_s9 + $0x48] sm:$0xff] (%p864_p5), %v534_v31 }
 0x10d   : > { %v450_v60 = vadd.f32 %v449_v57, %v448_v56  ;;  %v421_v61 = vadd.f32 %v420_v59, %v419_v55  ;;  %v530_v29 = vld [vmem:[%s939_s25 + $0x18] sm:$0xff] (%p864_p5)  ;;  %v532_v30 = vld [vmem:[%s939_s25 + $0x20] sm:$0xff] (%p864_p5) }
 0x10e   : > { %531 = vst [vmem:[%s481_s9 + $0x18] sm:$0xff] (%p864_p5), %v530_v29  ;;  %533 = vst [vmem:[%s481_s9 + $0x40] sm:$0xff] (%p864_p5), %v532_v30 }
 0x10f   : > { %v452_v1 = vadd.f32 %v451_v63, %v450_v60  ;;  %v423_v2 = vadd.f32 %v422_v62, %v421_v61  ;;  %v528_v28 = vld [vmem:[%s939_s25 + $0x10] sm:$0xff] (%p864_p5)  ;;  %v538_v33 = vld [vmem:[%s939_s25 + $0x38] sm:$0xff] (%p864_p5) }
 0x110   : > { %529 = vst [vmem:[%s481_s9 + $0x10] sm:$0xff] (%p864_p5), %v528_v28  ;;  %539 = vst [vmem:[%s481_s9 + $0x58] sm:$0xff] (%p864_p5), %v538_v33 }
 0x111   : > { %v425_v6 = vadd.f32 %v424_v5, %v423_v2  ;;  %v454_v7 = vadd.f32 %v453_v3, %v452_v1  ;;  %v536_v32 = vld [vmem:[%s939_s25 + $0x30] sm:$0xff] (%p864_p5) }
 0x112   : > { %537 = vst [vmem:[%s481_s9 + $0x50] sm:$0xff] (%p864_p5), %v536_v32 }
 0x113   : > { %v427_v10 = vadd.f32 %v426_v8, %v425_v6  ;;  %v456_v11 = vadd.f32 %v455_v9, %v454_v7 }
 0x115   : > { %v428_v13 = vrot.slane %v427_v10, 4  ;;  %v458_v14 = vadd.f32 %v457_v12, %v456_v11 }
 0x117   : > { %v429_v15 = vadd.f32 %v428_v13, %v427_v10  ;;  %v459_v16 = vrot.slane %v458_v14, 4 }
 0x119   : > { %v430_v17 = vrot.slane %v429_v15, 2  ;;  %v460_v18 = vadd.f32 %v459_v16, %v458_v14 }
 0x11b   : > { %v431_v19 = vadd.f32 %v430_v17, %v429_v15  ;;  %v461_v20 = vrot.slane %v460_v18, 2 }
 0x11d   : > { %v432_v21 = vrot.slane %v431_v19, 1  ;;  %v462_v22 = vadd.f32 %v461_v20, %v460_v18 }
 0x11f   : > { %v433_v23 = vadd.f32 %v432_v21, %v431_v19  ;;  %v463_v24 = vrot.slane %v462_v22, 1  ;;  %478 = sbr.rel (!%p864_p5) target bundleno = 292 (0x124), region = 70 }
 0x121   : > { %435 = vst.msk [vmem:[%s271_s29] sm:$0x1] %vm434_vm1, %v433_v23  ;;  %v464_v25 = vadd.f32 %v463_v24, %v462_v22 }
 0x123   : > { %465 = vst.msk [vmem:[%s274_s6] sm:$0x1] %vm434_vm1, %v464_v25 }
 0x124 PF: > { %p12_p11 = scmp.ge.s32.totalorder %s852_s19, 4   ;;  %s1011_s15 = smov %s802_s16 }
 0x125   : > { %s1012_s16 = smov %s862_s22  ;;  %s1013_s17 = smov %s852_s19 }
 0x126   :  { %14 = sbr.rel (!%p12_p11) target bundleno = 2 (0x2), region = 163 }

// kernel: resblock_forward_ncl.5
= control target key start
LH: loop header
LB: loop body
LE: loop exit
PB: predicated region body
PF: predicated region fallthrough
CT: control target
= control target key end

     0   :  { %s2147_s0 = inlined_call_operand.vmem [shape: f32[2,1,32], index: 0, kind: input, shape index: {}]   ;;  %s2148_s1 = inlined_call_operand.vmem [shape: f32[2,1,32], index: 1, kind: input, shape index: {}]   ;;  %s2149_s2 = inlined_call_operand.vmem [shape: f32[1,32], index: 2, kind: input, shape index: {}]   ;;  %s2150_s3 = inlined_call_operand.vmem [shape: f32[1,32], index: 3, kind: input, shape index: {}]   ;;  %s2151_s4 = inlined_call_operand.vmem [shape: f32[2,64,32], index: 4, kind: input, shape index: {}, may-alias: {4,5,6}]   ;;  %s2152_s5 = inlined_call_operand.vmem [shape: f32[2,64,32], index: 5, kind: input, shape index: {}, may-alias: {4,5,6}]   ;;  %s2153_s6 = inlined_call_operand.vmem [shape: f32[2,64,32], index: 6, kind: input, shape index: {}, may-alias: {4,5,6}]   ;;  %s2154_s7 = inlined_call_operand.vmem [shape: f32[3,32,32], index: 7, kind: input, shape index: {}]   ;;  %s2155_s8 = inlined_call_operand.vmem [shape: f32[2,64,32], index: 8, kind: output, shape index: {0}]   ;;  %s2156_s9 = inlined_call_operand.vmem [shape: f32[2,1,32], index: 9, kind: output, shape index: {1}]   ;;  %s2157_s10 = inlined_call_operand.vmem [shape: f32[2,1,32], index: 10, kind: output, shape index: {2}]  }
   0x1   :  { %2161 = sst [smem:[#allocation10_spill]] %s2151_s4 }
   0x2   :  { %2162 = sst [smem:[#allocation11_spill]] %s2155_s8 }
   0x3   :  { %2163 = sst [smem:[#allocation12_spill]] %s2157_s10 }
   0x4   :  { %s1750_s13 = smov 0   ;;  %s1752_s14 = smov 0  }
   0x5   :  { %s1754_s15 = smov 0   ;;  %s1756_s16 = smov 0  }
   0x6   :  { %s1758_s17 = smov 0   ;;  %s1760_s18 = smov 0  }
   0x7   :  { %s1762_s19 = smov 0  }
   0x8 LB: > { %2164 = sst [smem:[#allocation6_spill]] %s1689_s18  ;;  %s1786_s20 = sadd.s32 1, %s1693_s19   ;;  %s1693_s19 = sphi %s1762_s19, %s2175_s19   ;;  %s1689_s18 = sphi %s1760_s18, %s2178_s18   ;;  %s1685_s17 = sphi %s1758_s17, %s2177_s17   ;;  %s1681_s16 = sphi %s1756_s16, %s2182_s16   ;;  %s1677_s15 = sphi %s1754_s15, %s2181_s15   ;;  %s1673_s14 = sphi %s1752_s14, %s2180_s14   ;;  %s1669_s13 = sphi %s1750_s13, %s2179_s13  }
   0x9   : > { %2165 = sst [smem:[#allocation7_spill]] %s1786_s20  ;;  %s109_s21 = ssub.s32 %s1693_s19, %s1786_s20 }
   0xa   : > { %s112_s22 = sadd.s32 1, %s1689_s18  ;;  %p110_p0 = scmp.eq.s32.totalorder %s109_s21, 0 }
   0xb   : > { %p119_p1 = scmp.ne.s32.totalorder %s1689_s18, %s1685_s17  ;;  %p120_p2 = scmp.eq.s32.totalorder %s1693_s19, 0 }
   0xc   : > { %s1405_s23 = sshll.u32 %s1693_s19, 2  ;;  %s1808_s28 = sadd.s32 4294967295, %s1693_s19  }
   0xd   : > { %s1796_s24 = scalar_select %p110_p0, %s1689_s18, %s112_s22  }
   0xe   : > { %p1803_p3 = por %p120_p2, %p119_p1  ;;  %s1406_s26 = sadd.s32 4294967295, %s1405_s23 }
   0xf   : > { %2166 = sst [smem:[#allocation8_spill]] %s1796_s24  ;;  %p137_p4 = scmp.gt.s32.totalorder %s1406_s26, 0 }
  0x10   : > { %s1466_s27 = sadd.s32 4, %s1405_s23  ;;  %p153_p6 = scmp.ne.s32.totalorder %s1681_s16, %s1677_s15 }
  0x11   : > { %s1408_s29 = sadd.s32 4294967295, %s1466_s27  ;;  %s2184_s26 = smov (!%p137_p4, %s1406_s26), 0 }
  0x12   : > { %p141_p5 = scmp.gt.s32.totalorder %s1408_s29, 0  ;;  %p171_p7 = scmp.lt.s32.totalorder %s1466_s27, 7 }
  0x13   : > { %s1470_s30 = sadd.s32 4, %s1466_s27  ;;  %s146_s11 = sadd.s32 1, %s1681_s16 }
  0x14   : > { %s2186_s29 = smov (!%p141_p5, %s1408_s29), 0  ;;  %p1817_p8 = por %p153_p6, %p120_p2 }
  0x15   : > { %s143_s21 = ssub.s32 %s2184_s26, %s2186_s29  ;;  %p175_p9 = scmp.lt.s32.totalorder %s1470_s30, 7 }
  0x16   : > { %p144_p10 = scmp.eq.s32.totalorder %s143_s21, 0  ;;  %p187_p11 = scmp.ne.s32.totalorder %s1673_s14, %s1669_s13 }
  0x17   : > { %s2188_s27 = smov (!%p171_p7, %s1466_s27), 7  ;;  %s2190_s30 = smov (!%p175_p9, %s1470_s30), 7 }
  0x18   : > { %s1827_s22 = scalar_select %p144_p10, %s1681_s16, %s146_s11  }
  0x19   : > { %p1831_p12 = por %p187_p11, %p120_p2  ;;  %p238_p13 = scmp.eq.s32.totalorder %s1808_s28, 1 }
  0x1a   : > { %2169 = sst [smem:[#allocation9_spill]] %s1827_s22  ;;  %s177_s24 = ssub.s32 %s2188_s27, %s2190_s30 }
  0x1b   : > { %s180_s20 = sadd.s32 1, %s1673_s14  ;;  %p178_p0 = scmp.eq.s32.totalorder %s177_s24, 0 }
  0x1c   : > { %p1841_p4 = por %p238_p13, %p119_p1  ;;  %p1412_p5 = scmp.ge.s32.totalorder %s1693_s19, 2 }
  0x1d   : > { %s1846_s21 = scalar_select %p178_p0, %s1673_s14, %s180_s20  }
  0x1e   : > { %327 = sbr.rel (%p1412_p5) target bundleno = 61 (0x3d), region = 36 }
  0x23   : > { %330 = sbr.rel (!%p1803_p3) target bundleno = 49 (0x31), region = 40  ;;  %s332_s11 = sand.u32 (%p1803_p3), 1, %s1689_s18  }
  0x24   : > { %s1471_s22 = sshll.u32 (%p1803_p3), %s1693_s19, 5  ;;  %s1413_s30 = sshll.u32 (%p1803_p3), %s332_s11, 6 }
  0x25   : > { %s2172_s4 = sld [smem:[#allocation10_spill]] (%p1803_p3)  ;;  %s334_s20 = scalar_lea.vmem (%p1803_p3), [#allocation2], %s1413_s30 }
  0x2b   : > { %s337_s10 = scalar_lea.vmem %s2172_s4, %s1471_s22 }
  0x2c   : > { %v380_v0 = vld [vmem:[%s337_s10] sm:$0xff]  ;;  %v382_v1 = vld [vmem:[%s337_s10 + $0x8] sm:$0xff]  ;;  %v384_v2 = vld [vmem:[%s337_s10 + $0x10] sm:$0xff] }
  0x2d   : > { %381 = vst [vmem:[%s334_s20] sm:$0xff] %v380_v0  ;;  %383 = vst [vmem:[%s334_s20 + $0x8] sm:$0xff] %v382_v1  ;;  %v386_v3 = vld [vmem:[%s337_s10 + $0x18] sm:$0xff]  ;;  %v388_v4 = vld [vmem:[%s337_s10 + $0x40] sm:$0xff] }
  0x2e   : > { %385 = vst [vmem:[%s334_s20 + $0x10] sm:$0xff] %v384_v2  ;;  %v390_v5 = vld [vmem:[%s337_s10 + $0x48] sm:$0xff]  ;;  %387 = vst [vmem:[%s334_s20 + $0x18] sm:$0xff] %v386_v3  ;;  %v392_v6 = vld [vmem:[%s337_s10 + $0x50] sm:$0xff] }
  0x2f   : > { %389 = vst [vmem:[%s334_s20 + $0x20] sm:$0xff] %v388_v4  ;;  %391 = vst [vmem:[%s334_s20 + $0x28] sm:$0xff] %v390_v5  ;;  %v394_v7 = vld [vmem:[%s337_s10 + $0x58] sm:$0xff] }
  0x30   : > { %393 = vst [vmem:[%s334_s20 + $0x30] sm:$0xff] %v392_v6  ;;  %395 = vst [vmem:[%s334_s20 + $0x38] sm:$0xff] %v394_v7 }
  0x31 PF: > { %401 = sbr.rel (!%p1817_p8) target bundleno = 55 (0x37), region = 78  ;;  %s403_s8 = sand.u32 (%p1817_p8), 1, %s1681_s16  }
  0x32   : > { %s1419_s25 = sshll.u32 (%p1817_p8), %s2184_s26, 3  ;;  %s1416_s22 = sshll.u32 (%p1817_p8), %s403_s8, 4 }
  0x33   : > { %s411_s24 = scalar_lea.vmem (%p1817_p8), %s2152_s5, %s1419_s25  ;;  %s405_s4 = scalar_lea.vmem (%p1817_p8), [#allocation3], %s1416_s22 }
  0x34   : > { %v442_v8 = vld [vmem:[%s411_s24] sm:$0xff] (%p1817_p8) }
  0x35   : > { %v444_v9 = vld [vmem:[%s411_s24 + $0x40] sm:$0xff] (%p1817_p8)  ;;  %443 = vst [vmem:[%s405_s4] sm:$0xff] (%p1817_p8), %v442_v8 }
  0x36   : > { %445 = vst [vmem:[%s405_s4 + $0x8] sm:$0xff] %v444_v9 }
  0x37 PF: > { %451 = sbr.rel (!%p1831_p12) target bundleno = 61 (0x3d), region = 116  ;;  %s453_s10 = sand.u32 (%p1831_p12), 1, %s1673_s14  }
  0x38   : > { %s1422_s12 = sshll.u32 (%p1831_p12), %s2188_s27, 3  ;;  %s1420_s20 = sshll.u32 (%p1831_p12), %s453_s10, 4 }
  0x39   : > { %s461_s18 = scalar_lea.vmem (%p1831_p12), %s2153_s6, %s1422_s12  ;;  %s455_s25 = scalar_lea.vmem (%p1831_p12), [#allocation4], %s1420_s20 }
  0x3a   : > { %v492_v10 = vld [vmem:[%s461_s18] sm:$0xff] (%p1831_p12) }
  0x3b   : > { %v494_v11 = vld [vmem:[%s461_s18 + $0x40] sm:$0xff] (%p1831_p12)  ;;  %493 = vst [vmem:[%s455_s25] sm:$0xff] (%p1831_p12), %v492_v10 }
  0x3c   : > { %495 = vst [vmem:[%s455_s25 + $0x8] sm:$0xff] %v494_v11 }
  0x3d PF: > { %p1423_p1 = scmp.ge.s32.totalorder %s1693_s19, 1  ;;  %p500_p2 = scmp.lt.s32.totalorder %s1693_s19, 3 }
  0x3f   : > { %p501_p3 = pnand %p1423_p1, %p500_p2 }
  0x40   : > { %s514_s11 = sand.u32 (!%p501_p3), 1, %s1677_s15   ;;  %s507_s19 = sand.u32 (!%p501_p3), 1, %s1685_s17  }
  0x41   : > { %504 = sbr.rel (%p501_p3) target bundleno = 357 (0x165), region = 154  ;;  %s521_s30 = sand.u32 (!%p501_p3), 1, %s1669_s13  }
  0x42   : > { %s1425_s24 = sshll.u32 (!%p501_p3), %s514_s11, 4  ;;  %s1915_s10 = sshll.u32 (!%p501_p3), %s507_s19, 6 }
  0x43   : > { %s1917_s12 = sshll.u32 (!%p501_p3), %s521_s30, 4  ;;  %p662_p6 = scmp.gt.s32.totalorder (!%p501_p3), %s1808_s28, 0 }
  0x44   : > { %s516_s15 = scalar_lea.vmem (!%p501_p3), [#allocation3], %s1425_s24  ;;  %s509_s17 = scalar_lea.vmem (!%p501_p3), [#allocation2], %s1915_s10 }
  0x45   : > { %s523_s8 = scalar_lea.vmem (!%p501_p3), [#allocation4], %s1917_s12  ;;  %p581_p7 = scmp.lt.s32.totalorder (!%p501_p3), %s1808_s28, 1 }
  0x46   : > { %v748_v12 = vld [vmem:[%s2154_s7 + $0x18] sm:$0xff]  ;;  %v747_v13 = vld [vmem:[%s2154_s7 + $0x10] sm:$0xff]  ;;  %vm589_vm0 = vcmask 253952   ;;  %v587_v14 = vld [vmem:[%s2147_s0] sm:$0x1]  ;;  %v619_v34 = vlaneseq  ;;  %vm690_vm1 = vcmask 1040384  }
  0x47   : > { %1573 = vmatprep.subr.mxu1 %v748_v12  ;;  %1513 = vmatprep.subr.mxu0 %v748_v12  ;;  %v746_v15 = vld [vmem:[%s2154_s7 + $0x8] sm:$0xff]  ;;  %v588_v16 = vld [vmem:[%s2147_s0 + $0x1] sm:$0x1]  ;;  %v590_v17 = vsel %vm589_vm0, %v587_v14, 0.0  ;;  %v593_v19 = vld [vmem:[%s2148_s1] sm:$0x1] }
  0x48   : > { %1577 = vmatpush3.msra.mxu1 %v748_v12  ;;  %1514 = vmatpush3.msra.mxu0 %v748_v12  ;;  %v591_v18 = vsel %vm589_vm0, %v588_v16, 0.0  ;;  %v594_v20 = vld [vmem:[%s2148_s1 + $0x1] sm:$0x1]  ;;  %v595_v23 = vsel %vm589_vm0, %v593_v19, 0.0  ;;  %v1903_v27 = vld [vmem:[%s2154_s7 + $0x38] sm:$0xff]  ;;  %v620_v35 = vshrl.u32 %v619_v34, 7 }
  0x49   : > { %1574 = vmatprep.subr.mxu1 %v747_v13  ;;  %1515 = vmatprep.subr.mxu0 %v747_v13  ;;  %v745_v21 = vld [vmem:[%s2154_s7] sm:$0xff]  ;;  %v592_v22 = vadd.f32 %v591_v18, %v590_v17  ;;  %v596_v24 = vsel %vm589_vm0, %v594_v20, 0.0  ;;  %v1908_v29 = vld [vmem:[%s2154_s7 + $0x58] sm:$0xff]  ;;  %s1925_s13 = scalar_select %p662_p6, 1, 0  ;;  %v611_v46 = vld [vmem:[%s509_s17 + $0x8] sm:$0xff] }
  0x4a   : > { %1578 = vmatpush3.msra.mxu1 %v747_v13  ;;  %1516 = vmatpush3.msra.mxu0 %v747_v13  ;;  %v597_v25 = vadd.f32 %v596_v24, %v595_v23  ;;  %v603_v36 = vld [vmem:[%s2149_s2] sm:$0x1]  ;;  %v1923_v37 = vsub.s32 0, %v620_v35  ;;  %v654_v39 = vld [vmem:[%s516_s15 + $0x7] sm:$0x1]  ;;  %v615_v51 = vld [vmem:[%s509_s17 + $0x28] sm:$0xff] }
  0x4b   : > { %1575 = vmatprep.subr.mxu1 %v746_v15  ;;  %1517 = vmatprep.subr.mxu0 %v746_v15  ;;  %v598_v26 = vmul.f32 0.0078125, %v592_v22  ;;  %v655_v40 = vld [vmem:[%s516_s15 + $0xf] sm:$0x1]  ;;  %v610_v42 = vld [vmem:[%s509_s17] sm:$0xff]  ;;  %v612_v52 = vld [vmem:[%s509_s17 + $0x10] sm:$0xff]  ;;  %s664_s27 = scvt.s32.f32 %s1925_s13  ;;  %vm749_vm2 = vcmask 261120  }
  0x4c   : > { %1579 = vmatpush3.msra.mxu1 %v746_v15  ;;  %1518 = vmatpush3.msra.mxu0 %v746_v15  ;;  %v599_v28 = vmul.f32 0.0078125, %v597_v25  ;;  %v668_v43 = vld [vmem:[%s523_s8] sm:$0x1]  ;;  %v613_v58 = vld [vmem:[%s509_s17 + $0x18] sm:$0xff]  ;;  %s1955_s23 = scalar_select %p581_p7, 1, 0 }
  0x4d   : > { %1576 = vmatprep.subr.mxu1 %v745_v21  ;;  %1519 = vmatprep.subr.mxu0 %v745_v21  ;;  %v600_v30 = vmul.f32 %v598_v26, %v598_v26  ;;  %v607_v44 = vld [vmem:[%s2150_s3] sm:$0x1]  ;;  %v616_v53 = vld [vmem:[%s509_s17 + $0x30] sm:$0xff]  ;;  %v617_v59 = vld [vmem:[%s509_s17 + $0x38] sm:$0xff]  ;;  %v665_v3 = vstv %s664_s27  ;;  %vm709_vm3 = vcmask 1046528   ;;  %s2066_s25 = scalar_lea.vmem [#allocation5], %s1915_s10 }
  0x4e   : > { %1580 = vmatpush3.msra.mxu1 %v745_v21  ;;  %1520 = vmatpush3.msra.mxu0 %v745_v21  ;;  %v614_v45 = vld [vmem:[%s509_s17 + $0x20] sm:$0xff]  ;;  %s678_s22 = scvt.s32.f32 %s1955_s23  ;;  %s2173_s11 = sld [smem:[#allocation12_spill]] }
  0x4f   : > { %1533 = vmatprep.subr.mxu1 %v1903_v27  ;;  %1553 = vmatprep.subr.mxu0 %v1908_v29  ;;  %v601_v31 = vsub.f32 %v599_v28, %v600_v30  ;;  %s582_s10 = scalar_select %p581_p7, %s1808_s28, 1 }
  0x50   : > { %s1474_s30 = sshll.u32 (%p1841_p4), %s1808_s28, 5  ;;  %s2174_s20 = sld [smem:[#allocation11_spill]] (%p1841_p4) }
  0x51   : > { %v602_v32 = vmax.f32 %v601_v31, 0.0  ;;  %s583_s23 = scalar_lea.vmem %s2156_s9, %s582_s10 }
  0x53   : > { %v604_v33 = vadd.f32 1e-05, %v602_v32 }
  0x54   : > { %s586_s19 = scalar_lea.vmem %s2173_s11, %s582_s10 }
  0x55   : > { %1637 = vrsqrt.f32 %v604_v33  ;;  %v669_v33 = vld [vmem:[%s523_s8 + $0x8] sm:$0x1] }
  0x56   : > { %s1205_s26 = scalar_lea.vmem (%p1841_p4), %s2174_s20, %s1474_s30 }
  0x62   : > { %v1638_v38 = vpop.eup %1637 }
  0x63   : > { %v1927_v41 = vmul.f32 %v1638_v38, %v603_v36 }
  0x65   : > { %v608_v47 = vmul.f32 %v1927_v41, %v598_v26  ;;  %v622_v48 = vrot.slane %v1927_v41, %v1923_v37  ;;  %v656_v49 = vmul.f32 %v654_v39, %v1927_v41  ;;  %v657_v50 = vmul.f32 %v655_v40, %v1927_v41 }
  0x66   : > { %v670_v54 = vmul.f32 %v668_v43, %v1927_v41  ;;  %v1450_v43 = vld [vmem:[%s2154_s7 + $0x50] sm:$0xff] }
  0x67   : > { %v1943_v55 = vsub.f32 %v607_v44, %v608_v47  ;;  %v624_v56 = vmul.f32 %v622_v48, %v610_v42  ;;  %v628_v57 = vmul.f32 %v622_v48, %v614_v45  ;;  %v625_v60 = vmul.f32 %v622_v48, %v611_v46  ;;  %v1430_v42 = vld [vmem:[%s2154_s7 + $0x30] sm:$0xff] }
  0x68   : > { %v629_v61 = vmul.f32 %v622_v48, %v615_v51  ;;  %v626_v62 = vmul.f32 %v622_v48, %v612_v52  ;;  %v630_v63 = vmul.f32 %v622_v48, %v616_v53  ;;  %v627_v4 = vmul.f32 %v622_v48, %v613_v58  ;;  %v1449_v53 = vld [vmem:[%s2154_s7 + $0x48] sm:$0xff] }
  0x69   : > { %v636_v0 = vrot.slane %v1943_v55, %v1923_v37  ;;  %v658_v1 = vadd.f32 %v656_v49, %v1943_v55  ;;  %v659_v2 = vadd.f32 %v657_v50, %v1943_v55  ;;  %v631_v5 = vmul.f32 %v622_v48, %v617_v59  ;;  %v1429_v49 = vld [vmem:[%s2154_s7 + $0x28] sm:$0xff] }
  0x6a   : > { %v1951_v6 = vadd.f32 %v670_v54, %v1943_v55  ;;  %v671_v47 = vmul.f32 %v669_v33, %v1927_v41  ;;  %v679_v51 = vstv %s678_s22  ;;  %v1428_v54 = vld [vmem:[%s2154_s7 + $0x20] sm:$0xff] }
  0x6b   : > { %v638_v7 = vadd.f32 %v636_v0, %v624_v56  ;;  %v660_v8 = vmax.f32 %v658_v1, 0.0  ;;  %v642_v9 = vadd.f32 %v636_v0, %v628_v57  ;;  %v661_v10 = vmax.f32 %v659_v2, 0.0 }
  0x6c   : > { %v639_v11 = vadd.f32 %v636_v0, %v625_v60  ;;  %v643_v12 = vadd.f32 %v636_v0, %v629_v61  ;;  %v640_v13 = vadd.f32 %v636_v0, %v626_v62  ;;  %v644_v14 = vadd.f32 %v636_v0, %v630_v63  ;;  %v1448_v60 = vld [vmem:[%s2154_s7 + $0x40] sm:$0xff] }
  0x6d   : > { %v1957_v15 = vmax.f32 %v638_v7, 0.0  ;;  %v666_v16 = vmul.f32 %v665_v3, %v660_v8  ;;  %v1959_v17 = vmax.f32 %v642_v9, 0.0  ;;  %v667_v18 = vmul.f32 %v665_v3, %v661_v10 }
  0x6e   : > { %v1961_v19 = vmax.f32 %v639_v11, 0.0  ;;  %v1963_v20 = vmax.f32 %v643_v12, 0.0  ;;  %v1965_v21 = vmax.f32 %v640_v13, 0.0  ;;  %v1967_v22 = vmax.f32 %v644_v14, 0.0 }
  0x6f   : > { %v691_v23 = vrot.slane %v1957_v15, 7  ;;  %v698_v24 = vrot.slane %v1959_v17, 7  ;;  %v641_v25 = vadd.f32 %v636_v0, %v627_v4  ;;  %v645_v26 = vadd.f32 %v636_v0, %v631_v5 }
  0x70   : > { %v692_v28 = vrot.slane %v1961_v19, 7  ;;  %v699_v30 = vrot.slane %v1963_v20, 7  ;;  %v694_v31 = vrot.slane %v1965_v21, 7  ;;  %v701_v32 = vrot.slane %v1967_v22, 7 }
  0x71   : > { %v707_v34 = vsel %vm690_vm1, %v666_v16, %v691_v23  ;;  %v708_v35 = vsel %vm690_vm1, %v667_v18, %v698_v24  ;;  %v1980_v36 = vmax.f32 %v641_v25, 0.0  ;;  %v1982_v38 = vmax.f32 %v645_v26, 0.0 }
  0x72   : > { %1521 = vmatprep.mubr.msk.f32.mxu0 %vm749_vm2, %v707_v34  ;;  %1527 = vmatprep.mubr.msk.f32.mxu1 %vm749_vm2, %v708_v35  ;;  %v693_v39 = vsel %vm690_vm1, %v691_v23, %v692_v28  ;;  %v700_v40 = vsel %vm690_vm1, %v698_v24, %v699_v30  ;;  %v695_v44 = vsel %vm690_vm1, %v692_v28, %v694_v31  ;;  %v674_v50 = vmax.f32 %v1951_v6, 0.0 }
  0x73   : > { %1522 = vmatmul.mubr.msk.f32.vlgmr.msra.gmra.mxu0 %vm749_vm2, %v693_v39  ;;  %1528 = vmatmul.mubr.msk.f32.vlgmr.msra.gmra.mxu1 %vm749_vm2, %v700_v40  ;;  %v696_v45 = vrot.slane %v1980_v36, 7  ;;  %v703_v46 = vrot.slane %v1982_v38, 7  ;;  %v702_v48 = vsel %vm690_vm1, %v699_v30, %v701_v32  ;;  %v711_v41 = vrot.slane %v1961_v19, 1 }
  0x74   : > { %1534 = vmatpush3.msra.mxu1 %v1903_v27  ;;  %1554 = vmatpush3.msra.mxu0 %v1908_v29  ;;  %v710_v29 = vrot.slane %v1957_v15, 1  ;;  %v713_v56 = vrot.slane %v1965_v21, 1  ;;  %v680_v57 = vmul.f32 %v679_v51, %v674_v50  ;;  %v673_v58 = vadd.f32 %v671_v47, %v1943_v55 }
  0x75   : > { %1535 = vmatprep.subr.mxu1 %v1430_v42  ;;  %1555 = vmatprep.subr.mxu0 %v1450_v43  ;;  %v704_v52 = vsel %vm690_vm1, %v701_v32, %v703_v46  ;;  %v697_v27 = vsel %vm690_vm1, %v694_v31, %v696_v45  ;;  %v715_v59 = vrot.slane %v1980_v36, 1  ;;  %v717_v1 = vrot.slane %v1959_v17, 1 }
  0x76   : > { %1536 = vmatpush3.msra.mxu1 %v1430_v42  ;;  %1524 = vmatprep.mubr.msk.f32.mxu0 %vm749_vm2, %v695_v44  ;;  %v712_v61 = vsel %vm709_vm3, %v710_v29, %v711_v41  ;;  %v714_v55 = vsel %vm709_vm3, %v711_v41, %v713_v56  ;;  %v731_v62 = vrot.slane %v680_v57, %v1923_v37  ;;  %v675_v63 = vmax.f32 %v673_v58, 0.0 }
  0x77   : > { %1530 = vmatprep.mubr.msk.f32.mxu1 %vm749_vm2, %v702_v48  ;;  %1537 = vmatprep.subr.mxu1 %v1429_v49  ;;  %v716_v0 = vsel %vm709_vm3, %v713_v56, %v715_v59  ;;  %v718_v2 = vrot.slane %v1963_v20, 1  ;;  %v720_v4 = vrot.slane %v1967_v22, 1  ;;  %v722_v7 = vrot.slane %v1982_v38, 1 }
  0x78   : > { %1556 = vmatpush3.msra.mxu0 %v1450_v43  ;;  %1531 = vmatmul.mubr.msk.f32.gmra.mxu1 %vm749_vm2, %v704_v52  ;;  %v738_v3 = vsel %vm709_vm3, %v715_v59, %v731_v62  ;;  %v681_v5 = vmul.f32 %v679_v51, %v675_v63 }
  0x79   : > { %1525 = vmatmul.mubr.msk.f32.gmra.mxu0 %vm749_vm2, %v697_v27  ;;  %1538 = vmatpush3.msra.mxu1 %v1429_v49  ;;  %v719_v6 = vsel %vm709_vm3, %v717_v1, %v718_v2  ;;  %v721_v8 = vsel %vm709_vm3, %v718_v2, %v720_v4  ;;  %v723_v10 = vsel %vm709_vm3, %v720_v4, %v722_v7 }
  0x7a   : > { %1557 = vmatprep.subr.mxu0 %v1449_v53  ;;  %1539 = vmatprep.subr.mxu1 %v1428_v54  ;;  %v735_v9 = vrot.slane %v681_v5, %v1923_v37 }
  0x7b   : > { %1558 = vmatpush3.msra.mxu0 %v1449_v53  ;;  %1540 = vmatpush3.msra.mxu1 %v1428_v54 }
  0x7c   : > { %1559 = vmatprep.subr.mxu0 %v1448_v60  ;;  %1541 = vmatprep.mubr.msk.f32.mxu1 %vm749_vm2, %v1957_v15  ;;  %v739_v11 = vsel %vm709_vm3, %v722_v7, %v735_v9 }
  0x7d   : > { %1560 = vmatpush3.msra.mxu0 %v1448_v60  ;;  %1561 = vmatprep.mubr.msk.f32.mxu0 %vm749_vm2, %v712_v61 }
  0x7e   : > { %1542 = vmatmul.mubr.msk.f32.vlgmr.msra.gmra.mxu1 %vm749_vm2, %v1961_v19  ;;  %1562 = vmatmul.mubr.msk.f32.vlgmr.msra.gmra.mxu0 %vm749_vm2, %v714_v55 }
  0x7f   : > { %1544 = vmatprep.mubr.msk.f32.mxu1 %vm749_vm2, %v1965_v21  ;;  %1564 = vmatprep.mubr.msk.f32.mxu0 %vm749_vm2, %v716_v0 }
  0x82   : > { %1545 = vmatmul.mubr.msk.f32.gmra.mxu1 %vm749_vm2, %v1980_v36  ;;  %1565 = vmatmul.mubr.msk.f32.gmra.mxu0 %vm749_vm2, %v738_v3 }
  0x83   : > { %1547 = vmatprep.mubr.msk.f32.mxu1 %vm749_vm2, %v1959_v17  ;;  %1567 = vmatprep.mubr.msk.f32.mxu0 %vm749_vm2, %v719_v6 }
  0x86   : > { %1548 = vmatmul.mubr.msk.f32.gmra.mxu1 %vm749_vm2, %v1963_v20  ;;  %1568 = vmatmul.mubr.msk.f32.gmra.mxu0 %vm749_vm2, %v721_v8 }
  0x87   : > { %1550 = vmatprep.mubr.msk.f32.mxu1 %vm749_vm2, %v1967_v22  ;;  %1570 = vmatprep.mubr.msk.f32.mxu0 %vm749_vm2, %v723_v10 }
  0x8a   : > { %1551 = vmatmul.mubr.msk.f32.gmra.mxu1 %vm749_vm2, %v1982_v38  ;;  %1571 = vmatmul.mubr.msk.f32.gmra.mxu0 %vm749_vm2, %v739_v11 }
 0x133   : > { %v1523_v37 = vpop.f32.mrf.mxu0  ;;  %v1529_v12 = vpop.f32.mrf.mxu1 }
 0x135   : > { %v834_v13 = vpop.f32.mrf.mxu0  ;;  %v854_v14 = vpop.f32.mrf.mxu1 }
 0x138   : > { %v1532_v15 = vpop.f32.mrf.mxu1 }
 0x139   : > { %v1526_v16 = vpop.f32.mrf.mxu0 }
 0x13a   : > { %v864_v17 = vpop.f32.mrf.mxu1 }
 0x13b   : > { %v844_v18 = vpop.f32.mrf.mxu0 }
 0x13e   : > { %v1543_v19 = vpop.f32.mrf.mxu1  ;;  %v1563_v20 = vpop.f32.mrf.mxu0 }
 0x13f   : > { %v961_v21 = vadd.f32 %v1543_v19, %v1523_v37 }
 0x140   : > { %v955_v22 = vpop.f32.mrf.mxu1  ;;  %v1083_v23 = vpop.f32.mrf.mxu0 }
 0x141   : > { %v1123_v24 = vadd.f32 %v1563_v20, %v961_v21  ;;  %v956_v25 = vadd.f32 %v955_v22, %v834_v13 }
 0x142   : > { %v1546_v26 = vpop.f32.mrf.mxu1  ;;  %v1566_v28 = vpop.f32.mrf.mxu0 }
 0x143   : > { %1131 = vst.msk [vmem:[%s2066_s25 + $0x8] sm:$0xff] %vm749_vm2, %v1123_v24  ;;  %v1122_v30 = vadd.f32 %v1083_v23, %v956_v25  ;;  %v971_v31 = vadd.f32 %v1546_v26, %v1526_v16  ;;  %v1161_v36 = vmul.f32 %v1123_v24, %v1123_v24  ;;  %v1139_v44 = vsel %vm749_vm2, %v1123_v24, 0.0 }
 0x144   : > { %v965_v32 = vpop.f32.mrf.mxu1  ;;  %v1093_v33 = vpop.f32.mrf.mxu0 }
 0x145   : > { %1130 = vst.msk [vmem:[%s2066_s25] sm:$0xff] %vm749_vm2, %v1122_v30  ;;  %v1160_v34 = vmul.f32 %v1122_v30, %v1122_v30  ;;  %v1125_v35 = vadd.f32 %v1566_v28, %v971_v31  ;;  %v1138_v38 = vsel %vm749_vm2, %v1122_v30, 0.0  ;;  %v966_v39 = vadd.f32 %v965_v32, %v844_v18 }
 0x146   : > { %v1549_v40 = vpop.f32.mrf.mxu1  ;;  %v1569_v42 = vpop.f32.mrf.mxu0  ;;  %v1140_v49 = vadd.f32 %v1139_v44, %v1138_v38  ;;  %v1169_v27 = vsel %vm749_vm2, %v1161_v36, 0.0 }
 0x147   : > { %1133 = vst.msk [vmem:[%s2066_s25 + $0x18] sm:$0xff] %vm749_vm2, %v1125_v35  ;;  %v981_v43 = vadd.f32 %v1549_v40, %v1529_v12  ;;  %v1168_v45 = vsel %vm749_vm2, %v1160_v34, 0.0  ;;  %v1124_v46 = vadd.f32 %v1093_v33, %v966_v39  ;;  %v1163_v50 = vmul.f32 %v1125_v35, %v1125_v35 }
 0x148   : > { %v975_v47 = vpop.f32.mrf.mxu1  ;;  %v1103_v48 = vpop.f32.mrf.mxu0  ;;  %v1170_v54 = vadd.f32 %v1169_v27, %v1168_v45  ;;  %v1143_v59 = vsel %vm749_vm2, %v1125_v35, 0.0 }
 0x149   : > { %v1127_v51 = vadd.f32 %v1569_v42, %v981_v43  ;;  %v976_v52 = vadd.f32 %v975_v47, %v854_v14  ;;  %1132 = vst.msk [vmem:[%s2066_s25 + $0x10] sm:$0xff] %vm749_vm2, %v1124_v46  ;;  %v1141_v29 = vsel %vm749_vm2, %v1124_v46, 0.0  ;;  %v1162_v41 = vmul.f32 %v1124_v46, %v1124_v46 }
 0x14a   : > { %v1552_v53 = vpop.f32.mrf.mxu1  ;;  %v1142_v56 = vadd.f32 %v1141_v29, %v1140_v49  ;;  %v1572_v58 = vpop.f32.mrf.mxu0  ;;  %v1173_v62 = vsel %vm749_vm2, %v1163_v50, 0.0  ;;  %v1250_v42 = vld [vmem:[%s2066_s25 + $0x8] sm:$0xff] (%p1841_p4) }
 0x14b   : > { %1135 = vst.msk [vmem:[%s2066_s25 + $0x28] sm:$0xff] %vm749_vm2, %v1127_v51  ;;  %v1126_v57 = vadd.f32 %v1103_v48, %v976_v52  ;;  %v1171_v60 = vsel %vm749_vm2, %v1162_v41, 0.0  ;;  %v991_v61 = vadd.f32 %v1552_v53, %v1532_v15  ;;  %v1165_v2 = vmul.f32 %v1127_v51, %v1127_v51  ;;  %1251 = vst [vmem:[%s1205_s26 + $0x8] sm:$0xff] (%p1841_p4), %v1250_v42 }
 0x14c   : > { %v985_v55 = vpop.f32.mrf.mxu1  ;;  %v1172_v63 = vadd.f32 %v1171_v60, %v1170_v54  ;;  %v1144_v0 = vadd.f32 %v1143_v59, %v1142_v56  ;;  %v1113_v8 = vpop.f32.mrf.mxu0  ;;  %v1147_v9 = vsel %vm749_vm2, %v1127_v51, 0.0  ;;  %v1248_v40 = vld [vmem:[%s2066_s25] sm:$0xff] (%p1841_p4) }
 0x14d   : > { %1134 = vst.msk [vmem:[%s2066_s25 + $0x20] sm:$0xff] %vm749_vm2, %v1126_v57  ;;  %v1145_v1 = vsel %vm749_vm2, %v1126_v57, 0.0  ;;  %v1164_v3 = vmul.f32 %v1126_v57, %v1126_v57  ;;  %v1129_v4 = vadd.f32 %v1572_v58, %v991_v61  ;;  %v986_v5 = vadd.f32 %v985_v55, %v864_v17  ;;  %1249 = vst [vmem:[%s1205_s26] sm:$0xff] (%p1841_p4), %v1248_v40 }
 0x14e   : > { %v1146_v6 = vadd.f32 %v1145_v1, %v1144_v0  ;;  %v1174_v7 = vadd.f32 %v1173_v62, %v1172_v63  ;;  %v1177_v13 = vsel %vm749_vm2, %v1165_v2, 0.0  ;;  %v1254_v44 = vld [vmem:[%s2066_s25 + $0x18] sm:$0xff] (%p1841_p4) }
 0x14f   : > { %v1175_v10 = vsel %vm749_vm2, %v1164_v3, 0.0  ;;  %1137 = vst.msk [vmem:[%s2066_s25 + $0x38] sm:$0xff] %vm749_vm2, %v1129_v4  ;;  %v1128_v11 = vadd.f32 %v1113_v8, %v986_v5  ;;  %v1167_v14 = vmul.f32 %v1129_v4, %v1129_v4  ;;  %v1151_v19 = vsel %vm749_vm2, %v1129_v4, 0.0  ;;  %1255 = vst [vmem:[%s1205_s26 + $0x18] sm:$0xff] (%p1841_p4), %v1254_v44 }
 0x150   : > { %v1176_v37 = vadd.f32 %v1175_v10, %v1174_v7  ;;  %v1148_v12 = vadd.f32 %v1147_v9, %v1146_v6  ;;  %v1252_v43 = vld [vmem:[%s2066_s25 + $0x10] sm:$0xff] (%p1841_p4) }
 0x151   : > { %1136 = vst.msk [vmem:[%s2066_s25 + $0x30] sm:$0xff] %vm749_vm2, %v1128_v11  ;;  %v1149_v15 = vsel %vm749_vm2, %v1128_v11, 0.0  ;;  %v1166_v16 = vmul.f32 %v1128_v11, %v1128_v11  ;;  %v1181_v23 = vsel %vm749_vm2, %v1167_v14, 0.0  ;;  %1253 = vst [vmem:[%s1205_s26 + $0x10] sm:$0xff] (%p1841_p4), %v1252_v43 }
 0x152   : > { %v1150_v17 = vadd.f32 %v1149_v15, %v1148_v12  ;;  %v1178_v18 = vadd.f32 %v1177_v13, %v1176_v37  ;;  %v1258_v46 = vld [vmem:[%s2066_s25 + $0x28] sm:$0xff] (%p1841_p4) }
 0x153   : > { %v1179_v20 = vsel %vm749_vm2, %v1166_v16, 0.0  ;;  %1259 = vst [vmem:[%s1205_s26 + $0x48] sm:$0xff] (%p1841_p4), %v1258_v46 }
 0x154   : > { %v1152_v21 = vadd.f32 %v1151_v19, %v1150_v17  ;;  %v1180_v22 = vadd.f32 %v1179_v20, %v1178_v18  ;;  %v1256_v45 = vld [vmem:[%s2066_s25 + $0x20] sm:$0xff] (%p1841_p4) }
 0x155   : > { %1257 = vst [vmem:[%s1205_s26 + $0x40] sm:$0xff] (%p1841_p4), %v1256_v45 }
 0x156   : > { %v1153_v24 = vrot.slane %v1152_v21, 4  ;;  %v1182_v25 = vadd.f32 %v1181_v23, %v1180_v22  ;;  %v1262_v48 = vld [vmem:[%s2066_s25 + $0x38] sm:$0xff] (%p1841_p4) }
 0x157   : > { %1263 = vst [vmem:[%s1205_s26 + $0x58] sm:$0xff] (%p1841_p4), %v1262_v48 }
 0x158   : > { %v1154_v26 = vadd.f32 %v1153_v24, %v1152_v21  ;;  %v1183_v28 = vrot.slane %v1182_v25, 4  ;;  %v1260_v47 = vld [vmem:[%s2066_s25 + $0x30] sm:$0xff] (%p1841_p4) }
 0x159   : > { %1261 = vst [vmem:[%s1205_s26 + $0x50] sm:$0xff] (%p1841_p4), %v1260_v47 }
 0x15a   : > { %v1155_v30 = vrot.slane %v1154_v26, 2  ;;  %v1184_v31 = vadd.f32 %v1183_v28, %v1182_v25 }
 0x15c   : > { %v1156_v32 = vadd.f32 %v1155_v30, %v1154_v26  ;;  %v1185_v33 = vrot.slane %v1184_v31, 2 }
 0x15e   : > { %v1157_v34 = vrot.slane %v1156_v32, 1  ;;  %v1186_v35 = vadd.f32 %v1185_v33, %v1184_v31 }
 0x160   : > { %v1158_v36 = vadd.f32 %v1157_v34, %v1156_v32  ;;  %v1187_v38 = vrot.slane %v1186_v35, 1  ;;  %1202 = sbr.rel (!%p1841_p4) target bundleno = 357 (0x165), region = 170 }
 0x162   : > { %1159 = vst.msk [vmem:[%s583_s23] sm:$0x1] %vm589_vm0, %v1158_v36  ;;  %v1188_v39 = vadd.f32 %v1187_v38, %v1186_v35 }
 0x164   : > { %1189 = vst.msk [vmem:[%s586_s19] sm:$0x1] %vm589_vm0, %v1188_v39 }
 0x165 PF: > { %s2175_s19 = sld [smem:[#allocation7_spill]]  ;;  %s2179_s13 = smov %s1673_s14 }
 0x166   : > { %s2176_s28 = sld [smem:[#allocation9_spill]]  ;;  %s2180_s14 = smov %s1846_s21 }
 0x167   : > { %s2177_s17 = sld [smem:[#allocation6_spill]]  ;;  %s2181_s15 = smov %s1681_s16 }
 0x168   : > { %s2178_s18 = sld [smem:[#allocation8_spill]] }
 0x16b   : > { %p18_p8 = scmp.ge.s32.totalorder %s2175_s19, 4  }
 0x16c   : > { %s2182_s16 = smov %s2176_s28 }
 0x16d   :  { %20 = sbr.rel (!%p18_p8) target bundleno = 8 (0x8), region = 281 }

// kernel: resblock_forward_ncl.7
= control target key start
LH: loop header
LB: loop body
LE: loop exit
PB: predicated region body
PF: predicated region fallthrough
CT: control target
= control target key end

     0   :  { %11 = vsyncpa [#allocation5], 0  ;;  %s902_s0 = inlined_call_operand.vmem [shape: f32[2,1,128], index: 0, kind: input, shape index: {}]   ;;  %s903_s1 = inlined_call_operand.vmem [shape: f32[2,1,128], index: 1, kind: input, shape index: {}]   ;;  %s904_s2 = inlined_call_operand.vmem [shape: f32[1,128], index: 2, kind: input, shape index: {}]   ;;  %s905_s3 = inlined_call_operand.vmem [shape: f32[1,128], index: 3, kind: input, shape index: {}]   ;;  %s906_s4 = inlined_call_operand.vmem [shape: f32[2,64,128], index: 4, kind: input, shape index: {}]   ;;  %s907_s5 = inlined_call_operand.vmem [shape: f32[2,64,128], index: 5, kind: input, shape index: {}]   ;;  %s908_s6 = inlined_call_operand.hbm [shape: f32[2,64,128], index: 6, kind: output, shape index: {}]  }
   0x1   :  { %13 = vsyncpa [#allocation5 + $0x1], 0  ;;  %s768_s21 = smov 0   ;;  %s770_s22 = smov 0  }
   0x2   :  { %s772_s23 = smov 0   ;;  %s774_s24 = smov 0  }
   0x3 LB: > { %s614_s25 = sadd.s32 4294967295, %s724_s24   ;;  %s615_s26 = sadd.s32 4294967294, %s724_s24   ;;  %s724_s24 = sphi %s774_s24, %s915_s24   ;;  %s720_s23 = sphi %s772_s23, %s914_s23   ;;  %s716_s22 = sphi %s770_s22, %s913_s22   ;;  %s712_s21 = sphi %s768_s21, %s912_s21  }
   0x4   : > { %s791_s27 = sadd.s32 1, %s724_s24   ;;  %s110_s28 = sadd.s32 1, %s720_s23 }
   0x5   : > { %s107_s29 = ssub.s32 %s724_s24, %s791_s27  ;;  %p117_p0 = scmp.ne.s32.totalorder %s720_s23, %s716_s22 }
   0x6   : > { %p108_p1 = scmp.eq.s32.totalorder %s107_s29, 0  ;;  %p118_p2 = scmp.eq.s32.totalorder %s724_s24, 0 }
   0x7   : > { %p173_p3 = scmp.eq.s32.totalorder %s614_s25, 1  ;;  %p178_p4 = scmp.ne.s32.totalorder %s716_s22, %s712_s21 }
   0x8   : > { %s804_s30 = scalar_select %p108_p1, %s720_s23, %s110_s28  }
   0x9   : > { %p806_p5 = por %p118_p2, %p117_p0  ;;  %p810_p6 = por %p173_p3, %p117_p0 }
   0xa   : > { %p179_p7 = scmp.eq.s32.totalorder %s615_s26, 1  ;;  %p617_p9 = scmp.ge.s32.totalorder %s724_s24, 2 }
   0xc   : > { %p814_p8 = por %p179_p7, %p178_p4  ;;  %207 = sbr.rel (%p617_p9) target bundleno = 33 (0x21), region = 32 }
  0x11   : > { %210 = sbr.rel (!%p806_p5) target bundleno = 25 (0x19), region = 36  ;;  %s212_s10 = sand.u32 (%p806_p5), 1, %s720_s23  }
  0x12   : > { %s633_s11 = sshll.u32 (%p806_p5), %s724_s24, 5  ;;  %s618_s12 = sshll.u32 (%p806_p5), %s212_s10, 6 }
  0x13   : > { %s217_s15 = scalar_lea.vmem (%p806_p5), %s906_s4, %s633_s11  ;;  %s214_s16 = scalar_lea.vmem (%p806_p5), [#allocation2], %s618_s12 }
  0x14   : > { %v260_v0 = vld [vmem:[%s217_s15] sm:$0xff] (%p806_p5)  ;;  %v262_v1 = vld [vmem:[%s217_s15 + $0x8] sm:$0xff] (%p806_p5)  ;;  %v264_v2 = vld [vmem:[%s217_s15 + $0x10] sm:$0xff] (%p806_p5) }
  0x15   : > { %261 = vst [vmem:[%s214_s16] sm:$0xff] (%p806_p5), %v260_v0  ;;  %263 = vst [vmem:[%s214_s16 + $0x8] sm:$0xff] (%p806_p5), %v262_v1  ;;  %v266_v3 = vld [vmem:[%s217_s15 + $0x18] sm:$0xff] (%p806_p5)  ;;  %v268_v4 = vld [vmem:[%s217_s15 + $0x40] sm:$0xff] (%p806_p5) }
  0x16   : > { %265 = vst [vmem:[%s214_s16 + $0x10] sm:$0xff] %v264_v2  ;;  %v270_v5 = vld [vmem:[%s217_s15 + $0x48] sm:$0xff]  ;;  %267 = vst [vmem:[%s214_s16 + $0x18] sm:$0xff] %v266_v3  ;;  %v272_v6 = vld [vmem:[%s217_s15 + $0x50] sm:$0xff] }
  0x17   : > { %269 = vst [vmem:[%s214_s16 + $0x20] sm:$0xff] %v268_v4  ;;  %271 = vst [vmem:[%s214_s16 + $0x28] sm:$0xff] %v270_v5  ;;  %v274_v7 = vld [vmem:[%s217_s15 + $0x58] sm:$0xff] }
  0x18   : > { %273 = vst [vmem:[%s214_s16 + $0x30] sm:$0xff] %v272_v6  ;;  %275 = vst [vmem:[%s214_s16 + $0x38] sm:$0xff] %v274_v7 }
  0x19 PF: > { %281 = sbr.rel (!%p806_p5) target bundleno = 33 (0x21), region = 74  ;;  %s283_s17 = sand.u32 (%p806_p5), 1, %s720_s23  }
  0x1a   : > { %s634_s18 = sshll.u32 (%p806_p5), %s724_s24, 5  ;;  %s621_s19 = sshll.u32 (%p806_p5), %s283_s17, 6 }
  0x1b   : > { %s288_s28 = scalar_lea.vmem (%p806_p5), %s907_s5, %s634_s18  ;;  %s285_s29 = scalar_lea.vmem (%p806_p5), [#allocation3], %s621_s19 }
  0x1c   : > { %v331_v8 = vld [vmem:[%s288_s28] sm:$0xff] (%p806_p5)  ;;  %v333_v9 = vld [vmem:[%s288_s28 + $0x8] sm:$0xff] (%p806_p5)  ;;  %v335_v10 = vld [vmem:[%s288_s28 + $0x10] sm:$0xff] (%p806_p5) }
  0x1d   : > { %332 = vst [vmem:[%s285_s29] sm:$0xff] (%p806_p5), %v331_v8  ;;  %334 = vst [vmem:[%s285_s29 + $0x8] sm:$0xff] (%p806_p5), %v333_v9  ;;  %v337_v11 = vld [vmem:[%s288_s28 + $0x18] sm:$0xff] (%p806_p5)  ;;  %v339_v12 = vld [vmem:[%s288_s28 + $0x40] sm:$0xff] (%p806_p5) }
  0x1e   : > { %336 = vst [vmem:[%s285_s29 + $0x10] sm:$0xff] %v335_v10  ;;  %v341_v13 = vld [vmem:[%s288_s28 + $0x48] sm:$0xff]  ;;  %338 = vst [vmem:[%s285_s29 + $0x18] sm:$0xff] %v337_v11  ;;  %v343_v14 = vld [vmem:[%s288_s28 + $0x50] sm:$0xff] }
  0x1f   : > { %340 = vst [vmem:[%s285_s29 + $0x20] sm:$0xff] %v339_v12  ;;  %342 = vst [vmem:[%s285_s29 + $0x28] sm:$0xff] %v341_v13  ;;  %v345_v15 = vld [vmem:[%s288_s28 + $0x58] sm:$0xff] }
  0x20   : > { %344 = vst [vmem:[%s285_s29 + $0x30] sm:$0xff] %v343_v14  ;;  %346 = vst [vmem:[%s285_s29 + $0x38] sm:$0xff] %v345_v15 }
  0x21 PF: > { %p624_p10 = scmp.ge.s32.totalorder %s724_s24, 1  ;;  %p351_p11 = scmp.lt.s32.totalorder %s724_s24, 3 }
  0x23   : > { %p352_p12 = pnand %p624_p10, %p351_p11 }
  0x24   : > { %s358_s7 = sand.u32 (!%p352_p12), 1, %s716_s22  }
  0x25   : > { %355 = sbr.rel (%p352_p12) target bundleno = 97 (0x61), region = 112  ;;  %s852_s18 = sshll.u32 (!%p352_p12), %s358_s7, 6 }
  0x26   : > { %s360_s29 = scalar_lea.vmem (!%p352_p12), [#allocation2], %s852_s18  ;;  %s367_s10 = scalar_lea.vmem (!%p352_p12), [#allocation3], %s852_s18 }
  0x27   : > { %s397_s11 = scalar_lea.vmem (!%p352_p12), [#allocation4], %s852_s18  ;;  %s493_s12 = scalar_lea.sflag (!%p352_p12), [#allocation5], %s358_s7 }
  0x2a   : > { %v401_v16 = vld [vmem:[%s902_s0] sm:$0x1]  ;;  %v402_v17 = vld [vmem:[%s902_s0 + $0x1] sm:$0x1]  ;;  %vm403_vm0 = vcmask 1040384   ;;  %v433_v32 = vlaneseq  ;;  %v425_v40 = vld [vmem:[%s360_s29 + $0x8] sm:$0xff] }
  0x2b   : > { %v404_v18 = vsel %vm403_vm0, %v401_v16, 0.0  ;;  %v405_v19 = vsel %vm403_vm0, %v402_v17, 0.0  ;;  %v407_v20 = vld [vmem:[%s903_s1] sm:$0x1]  ;;  %v408_v22 = vld [vmem:[%s903_s1 + $0x1] sm:$0x1] }
  0x2c   : > { %v406_v21 = vadd.f32 %v405_v19, %v404_v18  ;;  %v409_v23 = vsel %vm403_vm0, %v407_v20, 0.0  ;;  %v410_v24 = vsel %vm403_vm0, %v408_v22, 0.0  ;;  %v434_v33 = vshrl.u32 %v433_v32, 7  ;;  %v417_v34 = vld [vmem:[%s904_s2] sm:$0x1]  ;;  %v426_v41 = vld [vmem:[%s360_s29 + $0x10] sm:$0xff] }
  0x2d   : > { %v411_v25 = vadd.f32 %v410_v24, %v409_v23  ;;  %v421_v38 = vld [vmem:[%s905_s3] sm:$0x1]  ;;  %v427_v42 = vld [vmem:[%s360_s29 + $0x18] sm:$0xff]  ;;  %v429_v46 = vld [vmem:[%s360_s29 + $0x28] sm:$0xff] }
  0x2e   : > { %v412_v26 = vmul.f32 0.0078125, %v406_v21  ;;  %v435_v35 = vsub.s32 0, %v434_v33  ;;  %v424_v39 = vld [vmem:[%s360_s29] sm:$0xff]  ;;  %v430_v47 = vld [vmem:[%s360_s29 + $0x30] sm:$0xff]  ;;  %v431_v48 = vld [vmem:[%s360_s29 + $0x38] sm:$0xff] }
  0x2f   : > { %v413_v27 = vmul.f32 0.0078125, %v411_v25  ;;  %v428_v45 = vld [vmem:[%s360_s29 + $0x20] sm:$0xff]  ;;  %v461_v59 = vld [vmem:[%s367_s10 + $0x8] sm:$0xff]  ;;  %v462_v61 = vld [vmem:[%s367_s10 + $0x10] sm:$0xff] }
  0x30   : > { %v414_v28 = vmul.f32 %v412_v26, %v412_v26  ;;  %v460_v58 = vld [vmem:[%s367_s10] sm:$0xff]  ;;  %v463_v62 = vld [vmem:[%s367_s10 + $0x18] sm:$0xff]  ;;  %v465_v4 = vld [vmem:[%s367_s10 + $0x28] sm:$0xff] }
  0x31   : > { %v464_v63 = vld [vmem:[%s367_s10 + $0x20] sm:$0xff]  ;;  %v466_v5 = vld [vmem:[%s367_s10 + $0x30] sm:$0xff]  ;;  %v467_v6 = vld [vmem:[%s367_s10 + $0x38] sm:$0xff] }
  0x32   : > { %v415_v29 = vsub.f32 %v413_v27, %v414_v28 }
  0x34   : > { %v416_v30 = vmax.f32 %v415_v29, 0.0 }
  0x36   : > { %v418_v31 = vadd.f32 1e-05, %v416_v30 }
  0x38   : > { %688 = vrsqrt.f32 %v418_v31 }
  0x45   : > { %v689_v36 = vpop.eup %688 }
  0x46   : > { %v420_v37 = vmul.f32 %v689_v36, %v417_v34 }
  0x48   : > { %v422_v43 = vmul.f32 %v420_v37, %v412_v26  ;;  %v436_v44 = vrot.slane %v420_v37, %v435_v35 }
  0x4a   : > { %v423_v49 = vsub.f32 %v421_v38, %v422_v43  ;;  %v438_v50 = vmul.f32 %v436_v44, %v424_v39  ;;  %v439_v51 = vmul.f32 %v436_v44, %v425_v40  ;;  %v440_v52 = vmul.f32 %v436_v44, %v426_v41 }
  0x4b   : > { %v441_v53 = vmul.f32 %v436_v44, %v427_v42  ;;  %v442_v54 = vmul.f32 %v436_v44, %v428_v45  ;;  %v443_v55 = vmul.f32 %v436_v44, %v429_v46  ;;  %v444_v56 = vmul.f32 %v436_v44, %v430_v47 }
  0x4c   : > { %v450_v57 = vrot.slane %v423_v49, %v435_v35  ;;  %v445_v60 = vmul.f32 %v436_v44, %v431_v48 }
  0x4e   : > { %v452_v0 = vadd.f32 %v450_v57, %v438_v50  ;;  %v453_v1 = vadd.f32 %v450_v57, %v439_v51  ;;  %v454_v2 = vadd.f32 %v450_v57, %v440_v52  ;;  %v455_v3 = vadd.f32 %v450_v57, %v441_v53 }
  0x4f   : > { %v456_v7 = vadd.f32 %v450_v57, %v442_v54  ;;  %v457_v8 = vadd.f32 %v450_v57, %v443_v55  ;;  %v458_v9 = vadd.f32 %v450_v57, %v444_v56  ;;  %v459_v10 = vadd.f32 %v450_v57, %v445_v60 }
  0x50   : > { %v468_v11 = vadd.f32 %v460_v58, %v452_v0  ;;  %v469_v12 = vadd.f32 %v461_v59, %v453_v1  ;;  %v470_v13 = vadd.f32 %v462_v61, %v454_v2  ;;  %v471_v14 = vadd.f32 %v463_v62, %v455_v3 }
  0x51   : > { %v472_v15 = vadd.f32 %v464_v63, %v456_v7  ;;  %v473_v16 = vadd.f32 %v465_v4, %v457_v8  ;;  %v474_v17 = vadd.f32 %v466_v5, %v458_v9  ;;  %v475_v18 = vadd.f32 %v467_v6, %v459_v10 }
  0x52   : > { %v476_v19 = vmax.f32 %v468_v11, 0.0  ;;  %v477_v20 = vmax.f32 %v469_v12, 0.0  ;;  %v478_v21 = vmax.f32 %v470_v13, 0.0  ;;  %v479_v22 = vmax.f32 %v471_v14, 0.0 }
  0x53   : > { %v480_v23 = vmax.f32 %v472_v15, 0.0  ;;  %v481_v24 = vmax.f32 %v473_v16, 0.0  ;;  %v482_v25 = vmax.f32 %v474_v17, 0.0  ;;  %v483_v26 = vmax.f32 %v475_v18, 0.0 }
  0x54   : > { %484 = vst [vmem:[%s397_s11] sm:$0xff] %v476_v19  ;;  %485 = vst [vmem:[%s397_s11 + $0x8] sm:$0xff] %v477_v20 }
  0x55   : > { %486 = vst [vmem:[%s397_s11 + $0x10] sm:$0xff] %v478_v21  ;;  %487 = vst [vmem:[%s397_s11 + $0x18] sm:$0xff] %v479_v22 }
  0x56   : > { %488 = vst [vmem:[%s397_s11 + $0x20] sm:$0xff] %v480_v23  ;;  %489 = vst [vmem:[%s397_s11 + $0x28] sm:$0xff] %v481_v24 }
  0x57   : > { %490 = vst [vmem:[%s397_s11 + $0x30] sm:$0xff] %v482_v25  ;;  %491 = vst [vmem:[%s397_s11 + $0x38] sm:$0xff] %v483_v26 }
  0x58   : > { %s635_s13 = sshll.u32 %s614_s25, 9  ;;  %s516_s14 = sshll.u32 %s397_s11, 4  ;;  %s517_s14 = int_to_ptr.vmem [resolvable:$true] %s516_s14 }
  0x59   : > { %s505_s17 = scalar_lea.hbm %s908_s6, %s635_s13  ;;  %s726_s18 = smov 512  }
  0x5a   : > { %636 = sst [smem:[#allocation7]] (%p810_p6), %s726_s18  ;;  %s727_s7 = smov 1024  }
  0x5b   : > { %637 = sst [smem:[#allocation7 + $0x1]] (%p810_p6), %s727_s7  ;;  %s728_s19 = smov 4  }
  0x5c   : > { %638 = sst [smem:[#allocation7 + $0x2]] (%p810_p6), %s728_s19  ;;  %s729_s20 = smov 128  }
  0x5d   : > { %639 = sst [smem:[#allocation7 + $0x3]] (%p810_p6), %s729_s20  ;;  %s730_s25 = smov 8  }
  0x5e   : > { %640 = sst [smem:[#allocation7 + $0x4]] (%p810_p6), %s729_s20  ;;  %s731_s26 = smov 131072  }
  0x5f   : > { %641 = sst [smem:[#allocation7 + $0x5]] (%p810_p6), %s730_s25  ;;  %s732_s28 = smov 0  }
  0x60   : > { %642 = dma.general (%p810_p6), %s517_s14, 1024, %s505_s17, %s493_s12, %s731_s26, [#allocation7], %s732_s28, 0  }
  0x61 PF: > { %s544_s29 = sand.u32 1, %s712_s21   ;;  %p645_p13 = pnand %p617_p9, %p814_p8 }
  0x62   : > { %s545_s10 = scalar_lea.sflag [#allocation5], %s544_s29 }
  0x63   : > { %p646_p0 = pneg %p645_p13 }
  0x65   : > { %707 = dma.done.wait (%p646_p0), %s545_s10, 1024  }
  0x66   : > { %709 = vsyncadd (%p646_p0), %s545_s10, 4294966272  ;;  %p16_p1 = scmp.ge.s32.totalorder %s791_s27, 4   ;;  %s912_s21 = smov %s716_s22 }
  0x67   : > { %s913_s22 = smov %s720_s23  ;;  %s914_s23 = smov %s804_s30 }
  0x68   : > { %s915_s24 = smov %s791_s27  ;;  %18 = sbr.rel (!%p16_p1) target bundleno = 3 (0x3), region = 173 }
  0x6d   :  { %550 = vsyncpa [#allocation5], 1 }
  0x6e   :  { %552 = vsyncpa [#allocation5 + $0x1], 1 }

</bundles_post_ra>
